<compile_context>
chip_gen: v5e
topology: v5e:2x2
jax: 0.10.0
libtpu: 0.0.40
codegen_flags: <defaults>
</compile_context>

<pallas_src>
import functools

import jax
import jax.numpy as jnp
from jax import lax
from jax.experimental import pallas as pl
from jax.experimental.pallas import tpu as pltpu

LANE = 128                       # lane width: channels / head slots padded to this
MATMUL_DTYPE = jnp.bfloat16      # MXU operand + HBM handoff dtype (f32 accumulation)


def _round_up(x, m):
    return ((x + m - 1) // m) * m


# ---------------------------------------------------------------------------
# Fused TemporalBlock kernel (one grid step == one batch element).
# ---------------------------------------------------------------------------
def _temporal_block_kernel(*refs, kernel_size, dilation, num_heads, has_down):
    if has_down:
        (x_ref, w1_ref, b1_ref, w2_ref, b2_ref,
         wqkv_ref, bqkv_ref, wo_ref, bo_ref,
         wd_ref, bd_ref, o_ref, conv_buf) = refs
    else:
        (x_ref, w1_ref, b1_ref, w2_ref, b2_ref,
         wqkv_ref, bqkv_ref, wo_ref, bo_ref,
         o_ref, conv_buf) = refs
        wd_ref = bd_ref = None

    L = x_ref.shape[1]
    Cp = o_ref.shape[2]
    pad = (kernel_size - 1) * dilation
    pad_al = conv_buf.shape[0] - L            # sublane-aligned zero-history prefix

    x = x_ref[0]                              # (L, Cin_p) bf16 (HBM handoff dtype)

    # Zero the causal history prefix of the staging buffer once per grid step
    # (full width so both convs see zeros regardless of channel count).
    if pad > 0:
        conv_buf[0:pad_al, :] = jnp.zeros((pad_al, conv_buf.shape[1]),
                                          conv_buf.dtype)

    # Causal dilated conv (+chomp) + ReLU as K accumulated matmuls of shifted views.
    # The bf16 input is staged once into a zero-prefixed buffer; each tap is a static
    # slice (no rolls, no selects). Matmuls are bf16 with f32 accumulation.
    def causal_conv_relu(src_bf16, w_ref, b_ref):
        cin = w_ref.shape[1]
        cout = w_ref.shape[2]
        if pad == 0:
            acc = jnp.dot(src_bf16, w_ref[0], preferred_element_type=jnp.float32)
        else:
            conv_buf[pad_al:pad_al + L, 0:cin] = src_bf16
            acc = jnp.zeros((L, cout), jnp.float32)
            for k in range(kernel_size):
                shift = (kernel_size - 1 - k) * dilation
                xk = conv_buf[pad_al - shift:pad_al - shift + L, 0:cin]
                acc = acc + jnp.dot(xk, w_ref[k],
                                    preferred_element_type=jnp.float32)
        return jnp.maximum(acc + b_ref[...], 0.0)

    h = causal_conv_relu(x, w1_ref, b1_ref)                       # conv1+chomp+relu
    h = causal_conv_relu(h.astype(MATMUL_DTYPE), w2_ref, b2_ref)  # conv2+chomp+relu

    # Packed QKV projection into 128-lane-aligned head slots. The 1/sqrt(dh) softmax
    # scale is already folded into the q columns/bias of wqkv. Cast to bf16 once.
    qkv = (jnp.dot(h.astype(MATMUL_DTYPE), wqkv_ref[...],
                   preferred_element_type=jnp.float32)
           + bqkv_ref[...]).astype(MATMUL_DTYPE)
    nhs = wqkv_ref.shape[1] // 3              # num_heads * head_slot
    hs = nhs // num_heads                     # per-head 128-lane slot
    q = qkv[:, 0 * nhs:1 * nhs]
    k_all = qkv[:, 1 * nhs:2 * nhs]
    v_all = qkv[:, 2 * nhs:3 * nhs]

    # Multi-head attention with the out-projection fused into the head loop:
    # y += (softmax(q_h k_h^T) v_h) @ wo_slot[h]. Every matmul is 128-lane aligned;
    # zero-padded slot lanes contribute exactly zero so results are exact.
    y = jnp.zeros((L, Cp), jnp.float32)
    for hd in range(num_heads):
        sl = slice(hd * hs, (hd + 1) * hs)
        s = lax.dot_general(q[:, sl], k_all[:, sl],
                            (((1,), (1,)), ((), ())),
                            preferred_element_type=jnp.float32)
        s = s - jnp.max(s, axis=-1, keepdims=True)
        p = jnp.exp(s)
        # softmax denom via EUP reciprocal (co-issues for free) instead of VALU divide
        p = p * pl.reciprocal(jnp.sum(p, axis=-1, keepdims=True), approx=True)
        ctx = jnp.dot(p.astype(MATMUL_DTYPE), v_all[:, sl],
                      preferred_element_type=jnp.float32)
        y = y + jnp.dot(ctx.astype(MATMUL_DTYPE), wo_ref[hd],
                        preferred_element_type=jnp.float32)
    y = y + bo_ref[...]

    # Residual (1x1 downsample if channel count changed) + ReLU, fused in-kernel.
    if has_down:
        res = jnp.dot(x, wd_ref[...], preferred_element_type=jnp.float32) + bd_ref[...]
    else:
        res = x.astype(jnp.float32)
    o_ref[0] = jnp.maximum(y + res, 0.0).astype(o_ref.dtype)


def temporal_block(x, p, *, kernel_size, dilation, num_heads):
    """x: (N, L, Cin_p) bf16 channel-padded -> (N, L, Cout_p) bf16 channel-padded."""
    N, L, cin_p = x.shape
    cout_p = p["conv1_b"].shape[1]
    has_down = "down_w" in p
    pad = (kernel_size - 1) * dilation
    pad_al = _round_up(pad, 16) if pad > 0 else 0   # bf16-pack-friendly prefix
    cmax = max(cin_p, cout_p)
    nhs = p["wqkv"].shape[1] // 3

    kernel = functools.partial(
        _temporal_block_kernel,
        kernel_size=kernel_size, dilation=dilation,
        num_heads=num_heads, has_down=has_down)

    def full(shape):
        return pl.BlockSpec(shape, lambda n, _l=len(shape): (0,) * _l)

    in_specs = [
        pl.BlockSpec((1, L, cin_p), lambda n: (n, 0, 0)),
        full(p["conv1_w"].shape), full(p["conv1_b"].shape),
        full(p["conv2_w"].shape), full(p["conv2_b"].shape),
        full(p["wqkv"].shape), full(p["bqkv"].shape),
        full(p["wo"].shape), full(p["bo"].shape),
    ]
    args = [x, p["conv1_w"], p["conv1_b"], p["conv2_w"], p["conv2_b"],
            p["wqkv"], p["bqkv"], p["wo"], p["bo"]]
    if has_down:
        in_specs += [full(p["down_w"].shape), full(p["down_b"].shape)]
        args += [p["down_w"], p["down_b"]]

    # VMEM footprint estimate: double-buffered I/O blocks + (double-buffered) weights
    # + conv staging scratch + live intermediates (qkv, per-head scores, f32 temps).
    est = 2 * (L * cin_p + L * cout_p) * 2
    est += 2 * sum(int(p[k].size) * p[k].dtype.itemsize for k in p if k != "c_real")
    est += (pad_al + L) * cmax * 2
    est += L * 3 * nhs * (4 + 2)
    est += 3 * L * L * 4
    est += 8 * L * cmax * 4
    vmem_bytes = min(max(32 * 1024 * 1024, int(est * 1.5)), 100 * 1024 * 1024)

    return pl.pallas_call(
        kernel,
        out_shape=jax.ShapeDtypeStruct((N, L, cout_p), MATMUL_DTYPE),
        grid=(N,),
        in_specs=in_specs,
        out_specs=pl.BlockSpec((1, L, cout_p), lambda n: (n, 0, 0)),
        scratch_shapes=[pltpu.VMEM((pad_al + L, cmax), MATMUL_DTYPE)],
        compiler_params=pltpu.CompilerParams(
            dimension_semantics=("parallel",),
            vmem_limit_bytes=vmem_bytes),
    )(*args)


def temporal_conv_net(x_ncl, params, kernel_size, num_heads=4):
    """x_ncl: (N, C_in, L) f32 -> (N, C_out, L) f32, matching the torch module."""
    N, c_in, L = x_ncl.shape
    x = jnp.transpose(x_ncl, (0, 2, 1))                       # NCL -> NLC
    cin_p = _round_up(c_in, LANE)
    # lane-dense channel pad + bf16 inter-block HBM handoff
    x = jnp.pad(x, ((0, 0), (0, 0), (0, cin_p - c_in))).astype(MATMUL_DTYPE)
    for i, p in enumerate(params):
        x = temporal_block(x, p, kernel_size=kernel_size,
                           dilation=2 ** i, num_heads=num_heads)
    x = x[:, :, :params[-1]["c_real"]].astype(jnp.float32)    # drop channel padding
    return jnp.transpose(x, (0, 2, 1))                        # NLC -> NCL


# ---------------------------------------------------------------------------
# Deterministic parameter init (same logical shapes as the torch module).
# Conv weights (Cout, Cin, K) -> tap-major (K, Cin_p, Cout_p) bf16 matmul form.
# MHA in-proj packed to a single (Cp, 3*num_heads*128) bf16 weight with each head in
# its own 128-lane slot and the softmax scale folded into the q section; the out-proj
# is stored head-slot-major as (num_heads, 128, Cp). Biases kept f32, zero-padded.
# ---------------------------------------------------------------------------
def init_params(key, num_inputs, num_channels, kernel_size, num_heads=4):
    params = []
    in_c = num_inputs
    for out_c in num_channels:
        key, *ks = jax.random.split(key, 12)
        cin_p = _round_up(in_c, LANE)
        cout_p = _round_up(out_c, LANE)
        dh = out_c // num_heads
        hs = _round_up(max(dh, 1), LANE)          # 128-lane-aligned head slot
        nhs = num_heads * hs
        p = {"c_real": out_c}

        w1 = jax.random.normal(ks[0], (out_c, in_c, kernel_size), jnp.float32) * 0.1
        w1t = jnp.transpose(w1, (2, 1, 0))                    # (K, Cin, Cout)
        p["conv1_w"] = jnp.pad(
            w1t, ((0, 0), (0, cin_p - in_c), (0, cout_p - out_c))).astype(MATMUL_DTYPE)
        b1 = jax.random.normal(ks[1], (out_c,), jnp.float32) * 0.1
        p["conv1_b"] = jnp.pad(b1, (0, cout_p - out_c)).reshape(1, cout_p)

        w2 = jax.random.normal(ks[2], (out_c, out_c, kernel_size), jnp.float32) * 0.1
        w2t = jnp.transpose(w2, (2, 1, 0))
        p["conv2_w"] = jnp.pad(
            w2t, ((0, 0), (0, cout_p - out_c), (0, cout_p - out_c))).astype(MATMUL_DTYPE)
        b2 = jax.random.normal(ks[3], (out_c,), jnp.float32) * 0.1
        p["conv2_b"] = jnp.pad(b2, (0, cout_p - out_c)).reshape(1, cout_p)

        # Attention in-proj: packed, head-slot aligned, q-scale folded in.
        in_proj_w = jax.random.normal(ks[4], (3 * out_c, out_c), jnp.float32) * 0.1
        in_proj_b = jax.random.normal(ks[5], (3 * out_c,), jnp.float32) * 0.1
        scale = float(dh) ** -0.5
        wqkv = jnp.zeros((cout_p, 3 * nhs), jnp.float32)
        bqkv = jnp.zeros((3 * nhs,), jnp.float32)
        for sec in range(3):                      # 0=q (scaled), 1=k, 2=v
            sec_scale = scale if sec == 0 else 1.0
            w_sec = in_proj_w[sec * out_c:(sec + 1) * out_c] * sec_scale
            b_sec = in_proj_b[sec * out_c:(sec + 1) * out_c] * sec_scale
            for h in range(num_heads):
                col = sec * nhs + h * hs
                wqkv = wqkv.at[:out_c, col:col + dh].set(
                    w_sec[h * dh:(h + 1) * dh].T)
                bqkv = bqkv.at[col:col + dh].set(b_sec[h * dh:(h + 1) * dh])
        p["wqkv"] = wqkv.astype(MATMUL_DTYPE)
        p["bqkv"] = bqkv.reshape(1, 3 * nhs)

        # Attention out-proj, head-slot-major rows: (num_heads, head_slot, Cp).
        wo = jax.random.normal(ks[6], (out_c, out_c), jnp.float32) * 0.1
        bo = jax.random.normal(ks[7], (out_c,), jnp.float32) * 0.1
        wo_slot = jnp.zeros((num_heads, hs, cout_p), jnp.float32)
        for h in range(num_heads):
            wo_slot = wo_slot.at[h, :dh, :out_c].set(wo[:, h * dh:(h + 1) * dh].T)
        p["wo"] = wo_slot.astype(MATMUL_DTYPE)
        p["bo"] = jnp.pad(bo, (0, cout_p - out_c)).reshape(1, cout_p)

        if in_c != out_c:
            wd = jax.random.normal(ks[8], (out_c, in_c, 1), jnp.float32) * 0.1
            p["down_w"] = jnp.pad(
                wd[:, :, 0].T, ((0, cin_p - in_c), (0, cout_p - out_c))).astype(MATMUL_DTYPE)
            bd = jax.random.normal(ks[9], (out_c,), jnp.float32) * 0.1
            p["down_b"] = jnp.pad(bd, (0, cout_p - out_c)).reshape(1, cout_p)

        params.append(p)
        in_c = out_c
    return params


if __name__ == "__main__":
    key = jax.random.PRNGKey(0)
    kx, kp = jax.random.split(key)

    num_inputs = 4
    num_channels = [8, 8]        # each divisible by num_heads=4
    kernel_size = 2
    N, L = 2, 16

    x = jax.random.normal(kx, (N, num_inputs, L), jnp.float32)   # PyTorch NCL layout
    params = init_params(kp, num_inputs, num_channels, kernel_size)

    out = temporal_conv_net(x, params, kernel_size)
    out = jax.block_until_ready(out)
    assert out.shape == (N, num_channels[-1], L), out.shape
    assert out.dtype == jnp.float32
    assert bool(jnp.all(jnp.isfinite(out)))
    print("KERNEL_OK")
</pallas_src>

<mosaic_0001>
module attributes {stable_mosaic.version = 11 : i64} {
  func.func @_temporal_block_kernel(%arg0: i32, %arg1: memref<1x16x128xbf16, #tpu.memory_space<vmem>>, %arg2: memref<2x128x128xbf16, #tpu.memory_space<vmem>>, %arg3: memref<1x128xf32, #tpu.memory_space<vmem>>, %arg4: memref<2x128x128xbf16, #tpu.memory_space<vmem>>, %arg5: memref<1x128xf32, #tpu.memory_space<vmem>>, %arg6: memref<128x1536xbf16, #tpu.memory_space<vmem>>, %arg7: memref<1x1536xf32, #tpu.memory_space<vmem>>, %arg8: memref<4x128x128xbf16, #tpu.memory_space<vmem>>, %arg9: memref<1x128xf32, #tpu.memory_space<vmem>>, %arg10: memref<128x128xbf16, #tpu.memory_space<vmem>>, %arg11: memref<1x128xf32, #tpu.memory_space<vmem>>, %arg12: memref<1x16x128xbf16, #tpu.memory_space<vmem>>, %arg13: memref<32x128xbf16, #tpu.memory_space<vmem>>) attributes {dimension_semantics = [#tpu.dimension_semantics<parallel>], iteration_bounds = array<i64: 2>, scalar_prefetch = 0 : i64, scratch_operands = 1 : i64, tpu.core_type = #tpu.core_type<tc>, window_params = [{transform_indices = @transform_0, window_bounds = array<i64: 1, 16, 128>}, {pipeline_mode = #tpu.pipeline_mode<synchronous>, transform_indices = @transform_1, window_bounds = array<i64: 2, 128, 128>}, {pipeline_mode = #tpu.pipeline_mode<synchronous>, transform_indices = @transform_2, window_bounds = array<i64: 1, 128>}, {pipeline_mode = #tpu.pipeline_mode<synchronous>, transform_indices = @transform_3, window_bounds = array<i64: 2, 128, 128>}, {pipeline_mode = #tpu.pipeline_mode<synchronous>, transform_indices = @transform_4, window_bounds = array<i64: 1, 128>}, {pipeline_mode = #tpu.pipeline_mode<synchronous>, transform_indices = @transform_5, window_bounds = array<i64: 128, 1536>}, {pipeline_mode = #tpu.pipeline_mode<synchronous>, transform_indices = @transform_6, window_bounds = array<i64: 1, 1536>}, {pipeline_mode = #tpu.pipeline_mode<synchronous>, transform_indices = @transform_7, window_bounds = array<i64: 4, 128, 128>}, {pipeline_mode = #tpu.pipeline_mode<synchronous>, transform_indices = @transform_8, window_bounds = array<i64: 1, 128>}, {pipeline_mode = #tpu.pipeline_mode<synchronous>, transform_indices = @transform_9, window_bounds = array<i64: 128, 128>}, {pipeline_mode = #tpu.pipeline_mode<synchronous>, transform_indices = @transform_10, window_bounds = array<i64: 1, 128>}, {transform_indices = @transform_11, window_bounds = array<i64: 1, 16, 128>}]} {
    %c0 = arith.constant 0 : index
    %c0_0 = arith.constant 0 : index
    %c0_1 = arith.constant 0 : index
    %0 = vector.load %arg1[%c0, %c0_0, %c0_1] : memref<1x16x128xbf16, #tpu.memory_space<vmem>>, vector<1x16x128xbf16>
    %1 = vector.shape_cast %0 : vector<1x16x128xbf16> to vector<16x128xbf16>
    %cst = arith.constant 0.000000e+00 : bf16
    %2 = vector.broadcast %cst : bf16 to vector<16x128xbf16>
    %c0_2 = arith.constant 0 : index
    %c0_3 = arith.constant 0 : index
    %3 = vector.load %arg13[%c0_2, %c0_3] : memref<32x128xbf16, #tpu.memory_space<vmem>>, vector<16x128xbf16>
    tpu.vector_store %arg13[%c0_2, %c0_3], %2 {strides = array<i32>} : memref<32x128xbf16, #tpu.memory_space<vmem>>, vector<16x128xbf16>,
    %c16 = arith.constant 16 : index
    %c0_4 = arith.constant 0 : index
    %4 = vector.load %arg13[%c16, %c0_4] : memref<32x128xbf16, #tpu.memory_space<vmem>>, vector<16x128xbf16>
    tpu.vector_store %arg13[%c16, %c0_4], %1 {strides = array<i32>} : memref<32x128xbf16, #tpu.memory_space<vmem>>, vector<16x128xbf16>,
    %cst_5 = arith.constant 0.000000e+00 : f32
    %5 = vector.broadcast %cst_5 : f32 to vector<16x128xf32>
    %c15 = arith.constant 15 : index
    %c0_6 = arith.constant 0 : index
    %6 = vector.load %arg13[%c15, %c0_6] : memref<32x128xbf16, #tpu.memory_space<vmem>>, vector<16x128xbf16>
    %c0_7 = arith.constant 0 : index
    %c0_8 = arith.constant 0 : index
    %c0_9 = arith.constant 0 : index
    %7 = vector.load %arg2[%c0_7, %c0_8, %c0_9] : memref<2x128x128xbf16, #tpu.memory_space<vmem>>, vector<1x128x128xbf16>
    %8 = vector.shape_cast %7 : vector<1x128x128xbf16> to vector<128x128xbf16>
    %cst_10 = arith.constant dense<0.000000e+00> : vector<16x128xf32>
    %9 = tpu.matmul %6, %8, %cst_10 {dimension_numbers = #tpu.dot_dimension_numbers<[1], [0], [0], [1], [0, 0, 1, 1], [], []>} : vector<16x128xbf16>, vector<128x128xbf16>, vector<16x128xf32> -> vector<16x128xf32>
    %10 = arith.addf %5, %9 : vector<16x128xf32>
    %c16_11 = arith.constant 16 : index
    %c0_12 = arith.constant 0 : index
    %11 = vector.load %arg13[%c16_11, %c0_12] : memref<32x128xbf16, #tpu.memory_space<vmem>>, vector<16x128xbf16>
    %c1 = arith.constant 1 : index
    %c0_13 = arith.constant 0 : index
    %c0_14 = arith.constant 0 : index
    %12 = vector.load %arg2[%c1, %c0_13, %c0_14] : memref<2x128x128xbf16, #tpu.memory_space<vmem>>, vector<1x128x128xbf16>
    %13 = vector.shape_cast %12 : vector<1x128x128xbf16> to vector<128x128xbf16>
    %cst_15 = arith.constant dense<0.000000e+00> : vector<16x128xf32>
    %14 = tpu.matmul %11, %13, %cst_15 {dimension_numbers = #tpu.dot_dimension_numbers<[1], [0], [0], [1], [0, 0, 1, 1], [], []>} : vector<16x128xbf16>, vector<128x128xbf16>, vector<16x128xf32> -> vector<16x128xf32>
    %15 = arith.addf %10, %14 : vector<16x128xf32>
    %c0_16 = arith.constant 0 : index
    %c0_17 = arith.constant 0 : index
    %16 = vector.load %arg3[%c0_16, %c0_17] : memref<1x128xf32, #tpu.memory_space<vmem>>, vector<1x128xf32>
    %17 = vector.broadcast %16 : vector<1x128xf32> to vector<16x128xf32>
    %18 = arith.addf %15, %17 : vector<16x128xf32>
    %cst_18 = arith.constant 0.000000e+00 : f32
    %19 = vector.broadcast %cst_18 : f32 to vector<16x128xf32>
    %20 = arith.maximumf %18, %19 : vector<16x128xf32>
    %21 = arith.truncf %20 : vector<16x128xf32> to vector<16x128xbf16>
    %c16_19 = arith.constant 16 : index
    %c0_20 = arith.constant 0 : index
    %22 = vector.load %arg13[%c16_19, %c0_20] : memref<32x128xbf16, #tpu.memory_space<vmem>>, vector<16x128xbf16>
    tpu.vector_store %arg13[%c16_19, %c0_20], %21 {strides = array<i32>} : memref<32x128xbf16, #tpu.memory_space<vmem>>, vector<16x128xbf16>,
    %cst_21 = arith.constant 0.000000e+00 : f32
    %23 = vector.broadcast %cst_21 : f32 to vector<16x128xf32>
    %c15_22 = arith.constant 15 : index
    %c0_23 = arith.constant 0 : index
    %24 = vector.load %arg13[%c15_22, %c0_23] : memref<32x128xbf16, #tpu.memory_space<vmem>>, vector<16x128xbf16>
    %c0_24 = arith.constant 0 : index
    %c0_25 = arith.constant 0 : index
    %c0_26 = arith.constant 0 : index
    %25 = vector.load %arg4[%c0_24, %c0_25, %c0_26] : memref<2x128x128xbf16, #tpu.memory_space<vmem>>, vector<1x128x128xbf16>
    %26 = vector.shape_cast %25 : vector<1x128x128xbf16> to vector<128x128xbf16>
    %cst_27 = arith.constant dense<0.000000e+00> : vector<16x128xf32>
    %27 = tpu.matmul %24, %26, %cst_27 {dimension_numbers = #tpu.dot_dimension_numbers<[1], [0], [0], [1], [0, 0, 1, 1], [], []>} : vector<16x128xbf16>, vector<128x128xbf16>, vector<16x128xf32> -> vector<16x128xf32>
    %28 = arith.addf %23, %27 : vector<16x128xf32>
    %c16_28 = arith.constant 16 : index
    %c0_29 = arith.constant 0 : index
    %29 = vector.load %arg13[%c16_28, %c0_29] : memref<32x128xbf16, #tpu.memory_space<vmem>>, vector<16x128xbf16>
    %c1_30 = arith.constant 1 : index
    %c0_31 = arith.constant 0 : index
    %c0_32 = arith.constant 0 : index
    %30 = vector.load %arg4[%c1_30, %c0_31, %c0_32] : memref<2x128x128xbf16, #tpu.memory_space<vmem>>, vector<1x128x128xbf16>
    %31 = vector.shape_cast %30 : vector<1x128x128xbf16> to vector<128x128xbf16>
    %cst_33 = arith.constant dense<0.000000e+00> : vector<16x128xf32>
    %32 = tpu.matmul %29, %31, %cst_33 {dimension_numbers = #tpu.dot_dimension_numbers<[1], [0], [0], [1], [0, 0, 1, 1], [], []>} : vector<16x128xbf16>, vector<128x128xbf16>, vector<16x128xf32> -> vector<16x128xf32>
    %33 = arith.addf %28, %32 : vector<16x128xf32>
    %c0_34 = arith.constant 0 : index
    %c0_35 = arith.constant 0 : index
    %34 = vector.load %arg5[%c0_34, %c0_35] : memref<1x128xf32, #tpu.memory_space<vmem>>, vector<1x128xf32>
    %35 = vector.broadcast %34 : vector<1x128xf32> to vector<16x128xf32>
    %36 = arith.addf %33, %35 : vector<16x128xf32>
    %cst_36 = arith.constant 0.000000e+00 : f32
    %37 = vector.broadcast %cst_36 : f32 to vector<16x128xf32>
    %38 = arith.maximumf %36, %37 : vector<16x128xf32>
    %39 = arith.truncf %38 : vector<16x128xf32> to vector<16x128xbf16>
    %c0_37 = arith.constant 0 : index
    %c0_38 = arith.constant 0 : index
    %40 = vector.load %arg6[%c0_37, %c0_38] : memref<128x1536xbf16, #tpu.memory_space<vmem>>, vector<128x1536xbf16>
    %cst_39 = arith.constant dense<0.000000e+00> : vector<16x1536xf32>
    %41 = tpu.matmul %39, %40, %cst_39 {dimension_numbers = #tpu.dot_dimension_numbers<[1], [0], [0], [1], [0, 0, 1, 1], [], []>} : vector<16x128xbf16>, vector<128x1536xbf16>, vector<16x1536xf32> -> vector<16x1536xf32>
    %c0_40 = arith.constant 0 : index
    %c0_41 = arith.constant 0 : index
    %42 = vector.load %arg7[%c0_40, %c0_41] : memref<1x1536xf32, #tpu.memory_space<vmem>>, vector<1x1536xf32>
    %43 = vector.broadcast %42 : vector<1x1536xf32> to vector<16x1536xf32>
    %44 = arith.addf %41, %43 : vector<16x1536xf32>
    %45 = arith.truncf %44 : vector<16x1536xf32> to vector<16x1536xbf16>
    %46 = vector.extract_strided_slice %45 {offsets = [0, 0], sizes = [16, 512], strides = [1, 1]} : vector<16x1536xbf16> to vector<16x512xbf16>
    %47 = vector.extract_strided_slice %45 {offsets = [0, 512], sizes = [16, 512], strides = [1, 1]} : vector<16x1536xbf16> to vector<16x512xbf16>
    %48 = vector.extract_strided_slice %45 {offsets = [0, 1024], sizes = [16, 512], strides = [1, 1]} : vector<16x1536xbf16> to vector<16x512xbf16>
    %cst_42 = arith.constant 0.000000e+00 : f32
    %49 = vector.broadcast %cst_42 : f32 to vector<16x128xf32>
    %50 = vector.extract_strided_slice %46 {offsets = [0, 0], sizes = [16, 128], strides = [1, 1]} : vector<16x512xbf16> to vector<16x128xbf16>
    %51 = vector.extract_strided_slice %47 {offsets = [0, 0], sizes = [16, 128], strides = [1, 1]} : vector<16x512xbf16> to vector<16x128xbf16>
    %cst_43 = arith.constant dense<0.000000e+00> : vector<16x16xf32>
    %52 = tpu.matmul %50, %51, %cst_43 {dimension_numbers = #tpu.dot_dimension_numbers<[1], [1], [0], [0], [0, 0, 1, 0], [], []>} : vector<16x128xbf16>, vector<16x128xbf16>, vector<16x16xf32> -> vector<16x16xf32>
    %cst_44 = arith.constant dense<0xFF800000> : vector<16xf32>
    %53 = vector.multi_reduction <maximumf>, %52, %cst_44 [1] : vector<16x16xf32> to vector<16xf32>
    %54 = vector.shape_cast %53 : vector<16xf32> to vector<16x1xf32>
    %55 = vector.broadcast %54 : vector<16x1xf32> to vector<16x16xf32>
    %56 = arith.subf %52, %55 : vector<16x16xf32>
    %57 = math.exp %56 : vector<16x16xf32>
    %cst_45 = arith.constant dense<0.000000e+00> : vector<16xf32>
    %58 = vector.multi_reduction <add>, %57, %cst_45 [1] : vector<16x16xf32> to vector<16xf32>
    %59 = vector.shape_cast %58 : vector<16xf32> to vector<16x1xf32>
    %60 = tpu.reciprocal %59 {approx = true} : vector<16x1xf32> -> vector<16x1xf32>
    %61 = vector.broadcast %60 : vector<16x1xf32> to vector<16x16xf32>
    %62 = arith.mulf %57, %61 : vector<16x16xf32>
    %63 = arith.truncf %62 : vector<16x16xf32> to vector<16x16xbf16>
    %64 = vector.extract_strided_slice %48 {offsets = [0, 0], sizes = [16, 128], strides = [1, 1]} : vector<16x512xbf16> to vector<16x128xbf16>
    %cst_46 = arith.constant dense<0.000000e+00> : vector<16x128xf32>
    %65 = tpu.matmul %63, %64, %cst_46 {dimension_numbers = #tpu.dot_dimension_numbers<[1], [0], [0], [1], [0, 0, 1, 1], [], []>} : vector<16x16xbf16>, vector<16x128xbf16>, vector<16x128xf32> -> vector<16x128xf32>
    %66 = arith.truncf %65 : vector<16x128xf32> to vector<16x128xbf16>
    %c0_47 = arith.constant 0 : index
    %c0_48 = arith.constant 0 : index
    %c0_49 = arith.constant 0 : index
    %67 = vector.load %arg8[%c0_47, %c0_48, %c0_49] : memref<4x128x128xbf16, #tpu.memory_space<vmem>>, vector<1x128x128xbf16>
    %68 = vector.shape_cast %67 : vector<1x128x128xbf16> to vector<128x128xbf16>
    %cst_50 = arith.constant dense<0.000000e+00> : vector<16x128xf32>
    %69 = tpu.matmul %66, %68, %cst_50 {dimension_numbers = #tpu.dot_dimension_numbers<[1], [0], [0], [1], [0, 0, 1, 1], [], []>} : vector<16x128xbf16>, vector<128x128xbf16>, vector<16x128xf32> -> vector<16x128xf32>
    %70 = arith.addf %49, %69 : vector<16x128xf32>
    %71 = vector.extract_strided_slice %46 {offsets = [0, 128], sizes = [16, 128], strides = [1, 1]} : vector<16x512xbf16> to vector<16x128xbf16>
    %72 = vector.extract_strided_slice %47 {offsets = [0, 128], sizes = [16, 128], strides = [1, 1]} : vector<16x512xbf16> to vector<16x128xbf16>
    %cst_51 = arith.constant dense<0.000000e+00> : vector<16x16xf32>
    %73 = tpu.matmul %71, %72, %cst_51 {dimension_numbers = #tpu.dot_dimension_numbers<[1], [1], [0], [0], [0, 0, 1, 0], [], []>} : vector<16x128xbf16>, vector<16x128xbf16>, vector<16x16xf32> -> vector<16x16xf32>
    %cst_52 = arith.constant dense<0xFF800000> : vector<16xf32>
    %74 = vector.multi_reduction <maximumf>, %73, %cst_52 [1] : vector<16x16xf32> to vector<16xf32>
    %75 = vector.shape_cast %74 : vector<16xf32> to vector<16x1xf32>
    %76 = vector.broadcast %75 : vector<16x1xf32> to vector<16x16xf32>
    %77 = arith.subf %73, %76 : vector<16x16xf32>
    %78 = math.exp %77 : vector<16x16xf32>
    %cst_53 = arith.constant dense<0.000000e+00> : vector<16xf32>
    %79 = vector.multi_reduction <add>, %78, %cst_53 [1] : vector<16x16xf32> to vector<16xf32>
    %80 = vector.shape_cast %79 : vector<16xf32> to vector<16x1xf32>
    %81 = tpu.reciprocal %80 {approx = true} : vector<16x1xf32> -> vector<16x1xf32>
    %82 = vector.broadcast %81 : vector<16x1xf32> to vector<16x16xf32>
    %83 = arith.mulf %78, %82 : vector<16x16xf32>
    %84 = arith.truncf %83 : vector<16x16xf32> to vector<16x16xbf16>
    %85 = vector.extract_strided_slice %48 {offsets = [0, 128], sizes = [16, 128], strides = [1, 1]} : vector<16x512xbf16> to vector<16x128xbf16>
    %cst_54 = arith.constant dense<0.000000e+00> : vector<16x128xf32>
    %86 = tpu.matmul %84, %85, %cst_54 {dimension_numbers = #tpu.dot_dimension_numbers<[1], [0], [0], [1], [0, 0, 1, 1], [], []>} : vector<16x16xbf16>, vector<16x128xbf16>, vector<16x128xf32> -> vector<16x128xf32>
    %87 = arith.truncf %86 : vector<16x128xf32> to vector<16x128xbf16>
    %c1_55 = arith.constant 1 : index
    %c0_56 = arith.constant 0 : index
    %c0_57 = arith.constant 0 : index
    %88 = vector.load %arg8[%c1_55, %c0_56, %c0_57] : memref<4x128x128xbf16, #tpu.memory_space<vmem>>, vector<1x128x128xbf16>
    %89 = vector.shape_cast %88 : vector<1x128x128xbf16> to vector<128x128xbf16>
    %cst_58 = arith.constant dense<0.000000e+00> : vector<16x128xf32>
    %90 = tpu.matmul %87, %89, %cst_58 {dimension_numbers = #tpu.dot_dimension_numbers<[1], [0], [0], [1], [0, 0, 1, 1], [], []>} : vector<16x128xbf16>, vector<128x128xbf16>, vector<16x128xf32> -> vector<16x128xf32>
    %91 = arith.addf %70, %90 : vector<16x128xf32>
    %92 = vector.extract_strided_slice %46 {offsets = [0, 256], sizes = [16, 128], strides = [1, 1]} : vector<16x512xbf16> to vector<16x128xbf16>
    %93 = vector.extract_strided_slice %47 {offsets = [0, 256], sizes = [16, 128], strides = [1, 1]} : vector<16x512xbf16> to vector<16x128xbf16>
    %cst_59 = arith.constant dense<0.000000e+00> : vector<16x16xf32>
    %94 = tpu.matmul %92, %93, %cst_59 {dimension_numbers = #tpu.dot_dimension_numbers<[1], [1], [0], [0], [0, 0, 1, 0], [], []>} : vector<16x128xbf16>, vector<16x128xbf16>, vector<16x16xf32> -> vector<16x16xf32>
    %cst_60 = arith.constant dense<0xFF800000> : vector<16xf32>
    %95 = vector.multi_reduction <maximumf>, %94, %cst_60 [1] : vector<16x16xf32> to vector<16xf32>
    %96 = vector.shape_cast %95 : vector<16xf32> to vector<16x1xf32>
    %97 = vector.broadcast %96 : vector<16x1xf32> to vector<16x16xf32>
    %98 = arith.subf %94, %97 : vector<16x16xf32>
    %99 = math.exp %98 : vector<16x16xf32>
    %cst_61 = arith.constant dense<0.000000e+00> : vector<16xf32>
    %100 = vector.multi_reduction <add>, %99, %cst_61 [1] : vector<16x16xf32> to vector<16xf32>
    %101 = vector.shape_cast %100 : vector<16xf32> to vector<16x1xf32>
    %102 = tpu.reciprocal %101 {approx = true} : vector<16x1xf32> -> vector<16x1xf32>
    %103 = vector.broadcast %102 : vector<16x1xf32> to vector<16x16xf32>
    %104 = arith.mulf %99, %103 : vector<16x16xf32>
    %105 = arith.truncf %104 : vector<16x16xf32> to vector<16x16xbf16>
    %106 = vector.extract_strided_slice %48 {offsets = [0, 256], sizes = [16, 128], strides = [1, 1]} : vector<16x512xbf16> to vector<16x128xbf16>
    %cst_62 = arith.constant dense<0.000000e+00> : vector<16x128xf32>
    %107 = tpu.matmul %105, %106, %cst_62 {dimension_numbers = #tpu.dot_dimension_numbers<[1], [0], [0], [1], [0, 0, 1, 1], [], []>} : vector<16x16xbf16>, vector<16x128xbf16>, vector<16x128xf32> -> vector<16x128xf32>
    %108 = arith.truncf %107 : vector<16x128xf32> to vector<16x128xbf16>
    %c2 = arith.constant 2 : index
    %c0_63 = arith.constant 0 : index
    %c0_64 = arith.constant 0 : index
    %109 = vector.load %arg8[%c2, %c0_63, %c0_64] : memref<4x128x128xbf16, #tpu.memory_space<vmem>>, vector<1x128x128xbf16>
    %110 = vector.shape_cast %109 : vector<1x128x128xbf16> to vector<128x128xbf16>
    %cst_65 = arith.constant dense<0.000000e+00> : vector<16x128xf32>
    %111 = tpu.matmul %108, %110, %cst_65 {dimension_numbers = #tpu.dot_dimension_numbers<[1], [0], [0], [1], [0, 0, 1, 1], [], []>} : vector<16x128xbf16>, vector<128x128xbf16>, vector<16x128xf32> -> vector<16x128xf32>
    %112 = arith.addf %91, %111 : vector<16x128xf32>
    %113 = vector.extract_strided_slice %46 {offsets = [0, 384], sizes = [16, 128], strides = [1, 1]} : vector<16x512xbf16> to vector<16x128xbf16>
    %114 = vector.extract_strided_slice %47 {offsets = [0, 384], sizes = [16, 128], strides = [1, 1]} : vector<16x512xbf16> to vector<16x128xbf16>
    %cst_66 = arith.constant dense<0.000000e+00> : vector<16x16xf32>
    %115 = tpu.matmul %113, %114, %cst_66 {dimension_numbers = #tpu.dot_dimension_numbers<[1], [1], [0], [0], [0, 0, 1, 0], [], []>} : vector<16x128xbf16>, vector<16x128xbf16>, vector<16x16xf32> -> vector<16x16xf32>
    %cst_67 = arith.constant dense<0xFF800000> : vector<16xf32>
    %116 = vector.multi_reduction <maximumf>, %115, %cst_67 [1] : vector<16x16xf32> to vector<16xf32>
    %117 = vector.shape_cast %116 : vector<16xf32> to vector<16x1xf32>
    %118 = vector.broadcast %117 : vector<16x1xf32> to vector<16x16xf32>
    %119 = arith.subf %115, %118 : vector<16x16xf32>
    %120 = math.exp %119 : vector<16x16xf32>
    %cst_68 = arith.constant dense<0.000000e+00> : vector<16xf32>
    %121 = vector.multi_reduction <add>, %120, %cst_68 [1] : vector<16x16xf32> to vector<16xf32>
    %122 = vector.shape_cast %121 : vector<16xf32> to vector<16x1xf32>
    %123 = tpu.reciprocal %122 {approx = true} : vector<16x1xf32> -> vector<16x1xf32>
    %124 = vector.broadcast %123 : vector<16x1xf32> to vector<16x16xf32>
    %125 = arith.mulf %120, %124 : vector<16x16xf32>
    %126 = arith.truncf %125 : vector<16x16xf32> to vector<16x16xbf16>
    %127 = vector.extract_strided_slice %48 {offsets = [0, 384], sizes = [16, 128], strides = [1, 1]} : vector<16x512xbf16> to vector<16x128xbf16>
    %cst_69 = arith.constant dense<0.000000e+00> : vector<16x128xf32>
    %128 = tpu.matmul %126, %127, %cst_69 {dimension_numbers = #tpu.dot_dimension_numbers<[1], [0], [0], [1], [0, 0, 1, 1], [], []>} : vector<16x16xbf16>, vector<16x128xbf16>, vector<16x128xf32> -> vector<16x128xf32>
    %129 = arith.truncf %128 : vector<16x128xf32> to vector<16x128xbf16>
    %c3 = arith.constant 3 : index
    %c0_70 = arith.constant 0 : index
    %c0_71 = arith.constant 0 : index
    %130 = vector.load %arg8[%c3, %c0_70, %c0_71] : memref<4x128x128xbf16, #tpu.memory_space<vmem>>, vector<1x128x128xbf16>
    %131 = vector.shape_cast %130 : vector<1x128x128xbf16> to vector<128x128xbf16>
    %cst_72 = arith.constant dense<0.000000e+00> : vector<16x128xf32>
    %132 = tpu.matmul %129, %131, %cst_72 {dimension_numbers = #tpu.dot_dimension_numbers<[1], [0], [0], [1], [0, 0, 1, 1], [], []>} : vector<16x128xbf16>, vector<128x128xbf16>, vector<16x128xf32> -> vector<16x128xf32>
    %133 = arith.addf %112, %132 : vector<16x128xf32>
    %c0_73 = arith.constant 0 : index
    %c0_74 = arith.constant 0 : index
    %134 = vector.load %arg9[%c0_73, %c0_74] : memref<1x128xf32, #tpu.memory_space<vmem>>, vector<1x128xf32>
    %135 = vector.broadcast %134 : vector<1x128xf32> to vector<16x128xf32>
    %136 = arith.addf %133, %135 : vector<16x128xf32>
    %c0_75 = arith.constant 0 : index
    %c0_76 = arith.constant 0 : index
    %137 = vector.load %arg10[%c0_75, %c0_76] : memref<128x128xbf16, #tpu.memory_space<vmem>>, vector<128x128xbf16>
    %cst_77 = arith.constant dense<0.000000e+00> : vector<16x128xf32>
    %138 = tpu.matmul %1, %137, %cst_77 {dimension_numbers = #tpu.dot_dimension_numbers<[1], [0], [0], [1], [0, 0, 1, 1], [], []>} : vector<16x128xbf16>, vector<128x128xbf16>, vector<16x128xf32> -> vector<16x128xf32>
    %c0_78 = arith.constant 0 : index
    %c0_79 = arith.constant 0 : index
    %139 = vector.load %arg11[%c0_78, %c0_79] : memref<1x128xf32, #tpu.memory_space<vmem>>, vector<1x128xf32>
    %140 = vector.broadcast %139 : vector<1x128xf32> to vector<16x128xf32>
    %141 = arith.addf %138, %140 : vector<16x128xf32>
    %142 = arith.addf %136, %141 : vector<16x128xf32>
    %cst_80 = arith.constant 0.000000e+00 : f32
    %143 = vector.broadcast %cst_80 : f32 to vector<16x128xf32>
    %144 = arith.maximumf %142, %143 : vector<16x128xf32>
    %145 = arith.truncf %144 : vector<16x128xf32> to vector<16x128xbf16>
    %c0_81 = arith.constant 0 : index
    %c0_82 = arith.constant 0 : index
    %c0_83 = arith.constant 0 : index
    %146 = vector.load %arg12[%c0_81, %c0_82, %c0_83] : memref<1x16x128xbf16, #tpu.memory_space<vmem>>, vector<1x16x128xbf16>
    %147 = vector.shape_cast %146 : vector<1x16x128xbf16> to vector<16x128xbf16>
    %148 = vector.shape_cast %145 : vector<16x128xbf16> to vector<1x16x128xbf16>
    tpu.vector_store %arg12[%c0_81, %c0_82, %c0_83], %148 {strides = array<i32>} : memref<1x16x128xbf16, #tpu.memory_space<vmem>>, vector<1x16x128xbf16>,
    return
  }
  func.func @transform_0(%arg0: i32) -> (i32, i32, i32) {
    %c0_i32 = arith.constant 0 : i32
    %c0_i32_0 = arith.constant 0 : i32
    %c0_i32_1 = arith.constant 0 : i32
    return %arg0, %c0_i32, %c0_i32_0 : i32, i32, i32
  }
  func.func @transform_1(%arg0: i32) -> (i32, i32, i32) {
    %c0_i32 = arith.constant 0 : i32
    %c0_i32_0 = arith.constant 0 : i32
    %c0_i32_1 = arith.constant 0 : i32
    %c0_i32_2 = arith.constant 0 : i32
    return %c0_i32, %c0_i32_0, %c0_i32_1 : i32, i32, i32
  }
  func.func @transform_2(%arg0: i32) -> (i32, i32) {
    %c0_i32 = arith.constant 0 : i32
    %c0_i32_0 = arith.constant 0 : i32
    %c0_i32_1 = arith.constant 0 : i32
    return %c0_i32, %c0_i32_0 : i32, i32
  }
  func.func @transform_3(%arg0: i32) -> (i32, i32, i32) {
    %c0_i32 = arith.constant 0 : i32
    %c0_i32_0 = arith.constant 0 : i32
    %c0_i32_1 = arith.constant 0 : i32
    %c0_i32_2 = arith.constant 0 : i32
    return %c0_i32, %c0_i32_0, %c0_i32_1 : i32, i32, i32
  }
  func.func @transform_4(%arg0: i32) -> (i32, i32) {
    %c0_i32 = arith.constant 0 : i32
    %c0_i32_0 = arith.constant 0 : i32
    %c0_i32_1 = arith.constant 0 : i32
    return %c0_i32, %c0_i32_0 : i32, i32
  }
  func.func @transform_5(%arg0: i32) -> (i32, i32) {
    %c0_i32 = arith.constant 0 : i32
    %c0_i32_0 = arith.constant 0 : i32
    %c0_i32_1 = arith.constant 0 : i32
    return %c0_i32, %c0_i32_0 : i32, i32
  }
  func.func @transform_6(%arg0: i32) -> (i32, i32) {
    %c0_i32 = arith.constant 0 : i32
    %c0_i32_0 = arith.constant 0 : i32
    %c0_i32_1 = arith.constant 0 : i32
    return %c0_i32, %c0_i32_0 : i32, i32
  }
  func.func @transform_7(%arg0: i32) -> (i32, i32, i32) {
    %c0_i32 = arith.constant 0 : i32
    %c0_i32_0 = arith.constant 0 : i32
    %c0_i32_1 = arith.constant 0 : i32
    %c0_i32_2 = arith.constant 0 : i32
    return %c0_i32, %c0_i32_0, %c0_i32_1 : i32, i32, i32
  }
  func.func @transform_8(%arg0: i32) -> (i32, i32) {
    %c0_i32 = arith.constant 0 : i32
    %c0_i32_0 = arith.constant 0 : i32
    %c0_i32_1 = arith.constant 0 : i32
    return %c0_i32, %c0_i32_0 : i32, i32
  }
  func.func @transform_9(%arg0: i32) -> (i32, i32) {
    %c0_i32 = arith.constant 0 : i32
    %c0_i32_0 = arith.constant 0 : i32
    %c0_i32_1 = arith.constant 0 : i32
    return %c0_i32, %c0_i32_0 : i32, i32
  }
  func.func @transform_10(%arg0: i32) -> (i32, i32) {
    %c0_i32 = arith.constant 0 : i32
    %c0_i32_0 = arith.constant 0 : i32
    %c0_i32_1 = arith.constant 0 : i32
    return %c0_i32, %c0_i32_0 : i32, i32
  }
  func.func @transform_11(%arg0: i32) -> (i32, i32, i32) {
    %c0_i32 = arith.constant 0 : i32
    %c0_i32_0 = arith.constant 0 : i32
    %c0_i32_1 = arith.constant 0 : i32
    return %arg0, %c0_i32, %c0_i32_0 : i32, i32, i32
  }
}

</mosaic_0001>

<bundles_post_ra>
// kernel: tpu_custom_call.1
= control target key start
LH: loop header
LB: loop body
LE: loop exit
PB: predicated region body
PF: predicated region fallthrough
CT: control target
= control target key end

     0   :  { %s4232_s0 = inlined_call_operand.hbm [shape: bf16[2,16,128], index: 0, kind: input, shape index: {}]   ;;  %s4233_s1 = inlined_call_operand.hbm [shape: bf16[2,128,128], index: 1, kind: input, shape index: {}]   ;;  %s4234_s2 = inlined_call_operand.vmem [shape: f32[1,128], index: 2, kind: input, shape index: {}]   ;;  %s4235_s3 = inlined_call_operand.hbm [shape: bf16[2,128,128], index: 3, kind: input, shape index: {}]   ;;  %s4236_s4 = inlined_call_operand.vmem [shape: f32[1,128], index: 4, kind: input, shape index: {}]   ;;  %s4237_s5 = inlined_call_operand.hbm [shape: bf16[128,1536], index: 5, kind: input, shape index: {}]   ;;  %s4238_s6 = inlined_call_operand.hbm [shape: f32[1,1536], index: 6, kind: input, shape index: {}]   ;;  %s4239_s7 = inlined_call_operand.hbm [shape: bf16[4,128,128], index: 7, kind: input, shape index: {}]   ;;  %s4240_s8 = inlined_call_operand.vmem [shape: f32[1,128], index: 8, kind: input, shape index: {}]   ;;  %s4241_s9 = inlined_call_operand.hbm [shape: bf16[128,128], index: 9, kind: input, shape index: {}]   ;;  %s4242_s10 = inlined_call_operand.vmem [shape: f32[1,128], index: 10, kind: input, shape index: {}]   ;;  %s4243_s11 = inlined_call_operand.hbm [shape: bf16[2,16,128], index: 11, kind: output, shape index: {}]  }
   0x1   :  { %4247 = sst [smem:[#allocation21_spill]] %s4233_s1 }
   0x2   :  { %4248 = sst [smem:[#allocation22_spill]] %s4235_s3 }
   0x3   :  { %4249 = sst [smem:[#allocation23_spill]] %s4237_s5 }
   0x4   :  { %4250 = sst [smem:[#allocation24_spill]] %s4238_s6 }
   0x5   :  { %4251 = sst [smem:[#allocation25_spill]] %s4242_s10 }
   0x6   :  { %4252 = sst [smem:[#allocation26_spill]] %s4243_s11 }
   0x7   :  { %16 = vsyncpa [#allocation4], 0 }
   0x8   :  { %18 = vsyncpa [#allocation4 + $0x1], 0 }
   0x9   :  { %19 = vsyncpa [#allocation7], 0 }
   0xa   :  { %20 = vsyncpa [#allocation10], 0 }
   0xb   :  { %21 = vsyncpa [#allocation13], 0 }
   0xc   :  { %22 = vsyncpa [#allocation5], 0 }
   0xd   :  { %24 = vsyncpa [#allocation5 + $0x1], 0  ;;  %s3962_s17 = smov 0   ;;  %s3964_s18 = smov 0  }
   0xe   :  { %s3966_s19 = smov 0   ;;  %s3968_s20 = smov 0  }
   0xf LB: > { %s4253_s1 = sld [smem:[#allocation21_spill]]  ;;  %s3986_s24 = sadd.s32 4294967295, %s3887_s20   ;;  %s3887_s20 = sphi %s3968_s20, %s4272_s20   ;;  %s3883_s19 = sphi %s3966_s19, %s4271_s19   ;;  %s3879_s18 = sphi %s3964_s18, %s4270_s18   ;;  %s3875_s17 = sphi %s3962_s17, %s4269_s17  }
  0x10   : > { %p2542_p0 = scmp.ge.s32.totalorder %s3887_s20, 1  ;;  %p51_p1 = scmp.eq.s32.totalorder %s3986_s24, 0 }
  0x11   : > { %p297_p2 = scmp.lt.s32.totalorder %s3887_s20, 3  ;;  %s3889_s26 = smov [#allocation6]  }
  0x12   : > { %s310_s27 = sshll.u32 %s3889_s26, 4  ;;  %s4255_s5 = sld [smem:[#allocation23_spill]]  ;;  %s311_s27 = int_to_ptr.vmem [resolvable:$true] %s310_s27 }
  0x13   : > { %p3991_p3 = pnand %p2542_p0, %p297_p2  ;;  %s3890_s13 = smov [#allocation9]  }
  0x14   : > { %s344_s14 = sshll.u32 %s3890_s13, 4  ;;  %s4245_s15 = smov 64   ;;  %s345_s14 = int_to_ptr.vmem [resolvable:$true] %s344_s14 }
  0x15   : > { %s308_s23 = sshll.u32 %s4253_s1, 4  ;;  %p3477_p4 = pneg %p3991_p3  ;;  %s309_s23 = int_to_ptr.hbm [resolvable:$true] %s308_s23 }
  0x16   : > { %s4246_s16 = smov 4   ;;  %s3893_s21 = smov 768  }
  0x17   : > { %p4003_p6 = pnand %p3477_p4, %p51_p1  ;;  %s3894_s22 = smov 48  }
  0x18   : > { %s342_s30 = sshll.u32 %s4255_s5, 4  ;;  %s368_s29 = sshll.u32 %s4239_s7, 4  ;;  %s343_s30 = int_to_ptr.hbm [resolvable:$true] %s342_s30  ;;  %s369_s29 = int_to_ptr.hbm [resolvable:$true] %s368_s29 }
  0x19   : > { %3480 = dma.hbm_to_vmem [thread:$0]  (!%p4003_p6), %s309_s23, 2048, %s311_s27, [#allocation7], %s4245_s15, %s4245_s15, %s4246_s16  }
  0x1a   : > { %3486 = dma.hbm_to_vmem [thread:$0]  (!%p4003_p6), %s343_s30, 12288, %s345_s14, [#allocation10], %s3893_s21, %s3893_s21, %s3894_s22  }
  0x1b   : > { %s3895_s1 = smov [#allocation12]   ;;  %s4257_s3 = sld [smem:[#allocation22_spill]] }
  0x1c   : > { %s370_s13 = sshll.u32 %s3895_s1, 4  ;;  %s3896_s23 = smov [#allocation8]   ;;  %s371_s13 = int_to_ptr.vmem [resolvable:$true] %s370_s13 }
  0x1d   : > { %3492 = dma.hbm_to_vmem [thread:$0]  (!%p4003_p6), %s369_s29, 4096, %s371_s13, [#allocation13], %s4245_s15, %s4245_s15, %s4246_s16  }
  0x1e   : > { %s327_s27 = sshll.u32 %s3896_s23, 4  ;;  %s4258_s6 = sld [smem:[#allocation24_spill]]  ;;  %s328_s27 = int_to_ptr.vmem [resolvable:$true] %s327_s27 }
  0x1f   : > { %s385_s21 = sshll.u32 %s4241_s9, 4  ;;  %s3897_s22 = smov [#allocation11]   ;;  %s386_s21 = int_to_ptr.hbm [resolvable:$true] %s385_s21 }
  0x20   : > { %s359_s26 = sshll.u32 %s3897_s22, 4  ;;  %s3898_s28 = smov [#allocation14]   ;;  %s360_s26 = int_to_ptr.vmem [resolvable:$true] %s359_s26 }
  0x21   : > { %s325_s10 = sshll.u32 %s4257_s3, 4  ;;  %s2541_s29 = sadd.s32 4294967294, %s3887_s20   ;;  %s326_s10 = int_to_ptr.hbm [resolvable:$true] %s325_s10 }
  0x22   : > { %3483 = dma.hbm_to_vmem [thread:$0]  (!%p4003_p6), %s326_s10, 2048, %s328_s27, [#allocation7], %s4245_s15, %s4245_s15, %s4246_s16  }
  0x23   : > { %s387_s10 = sshll.u32 %s3898_s28, 4  ;;  %s4045_s13 = sadd.s32 1, %s3887_s20   ;;  %s388_s10 = int_to_ptr.vmem [resolvable:$true] %s387_s10 }
  0x24   : > { %s357_s1 = sshll.u32 %s4258_s6, 4  ;;  %s34_s23 = ssub.s32 %s3887_s20, %s4045_s13  ;;  %s358_s1 = int_to_ptr.hbm [resolvable:$true] %s357_s1 }
  0x25   : > { %3489 = dma.hbm_to_vmem [thread:$0]  (!%p4003_p6), %s358_s1, 192, %s360_s26, [#allocation10]  }
  0x26   : > { %3495 = dma.hbm_to_vmem [thread:$0]  (!%p4003_p6), %s386_s21, 1024, %s388_s10, [#allocation13], %s4245_s15, %s4245_s15, %s4246_s16  }
  0x27   : > { %s37_s27 = sadd.s32 1, %s3883_s19  ;;  %p35_p7 = scmp.eq.s32.totalorder %s34_s23, 0 }
  0x28   : > { %p44_p8 = scmp.ne.s32.totalorder %s3883_s19, %s3879_s18  ;;  %p45_p9 = scmp.eq.s32.totalorder %s3887_s20, 0 }
  0x29   : > { %p50_p10 = scmp.ne.s32.totalorder %s3879_s18, %s3875_s17  ;;  %p284_p13 = scmp.eq.s32.totalorder %s3986_s24, 1 }
  0x2a   : > { %s4056_s30 = scalar_select %p35_p7, %s3883_s19, %s37_s27  }
  0x2b   : > { %p4058_p11 = por %p45_p9, %p44_p8  ;;  %p4064_p12 = por %p51_p1, %p50_p10 }
  0x2c   : > { %p290_p0 = scmp.eq.s32.totalorder %s2541_s29, 1  ;;  %p3510_p2 = scmp.lt.s32.totalorder %s3887_s20, 2 }
  0x2d   : > { %s404_s1 = sand.u32 1, %s3883_s19   ;;  %p4071_p4 = por %p284_p13, %p44_p8 }
  0x2e   : > { %p4075_p6 = por %p290_p0, %p50_p10  ;;  %s2550_s21 = sshll.u32 %s404_s1, 3 }
  0x2f   : > { %s3247_s22 = sshll.u32 %s3887_s20, 3  ;;  %s408_s23 = scalar_lea.vmem [#allocation3], %s2550_s21 }
  0x30   : > { %s413_s10 = scalar_lea.hbm %s4232_s0, %s3247_s22  ;;  %s416_s27 = sshll.u32 %s408_s23, 4  ;;  %s417_s27 = int_to_ptr.vmem [resolvable:$true] %s416_s27 }
  0x31   : > { %s414_s15 = sshll.u32 %s413_s10, 4  ;;  %p4085_p7 = pnand %p3510_p2, %p4058_p11  ;;  %s415_s15 = int_to_ptr.hbm [resolvable:$true] %s414_s15 }
  0x32   : > { %s405_s16 = scalar_lea.sflag [#allocation4], %s404_s1  ;;  %s3779_s3 = sshra.s32 %s415_s15, 4  ;;  %s3780_s3 = int_to_ptr.hbm [resolvable:$true] %s3779_s3 }
  0x33   : > { %s3781_s6 = scalar_lea.hbm %s3780_s3, 8  ;;  %p3783_p9 = pneg %p4085_p7 }
  0x34   : > { %p3782_p8 = scmp.ne.s32.totalorder %s3780_s3, %s3781_s6  ;;  %s3786_s26 = scalar_lea.hbm %s4232_s0, 16 }
  0x35   : > { %p3787_p11 = scmp.lt.s32.totalorder %s3780_s3, %s4232_s0  ;;  %p3788_p0 = scmp.lt.s32.totalorder %s3786_s26, %s3781_s6 }
  0x36   : > { %p3784_p10 = pnand %p3783_p9, %p3782_p8 }
  0x37   : > { %p3789_p2 = por %p3788_p0, %p3787_p11 }
  0x38   : > { %p3785_p13 = pneg %p3784_p10 }
  0x3a   : > { %p3790_p5 = pnand %p3789_p2, %p3785_p13 }
  0x3c   : > { %3793 = shalt.err (!%p3790_p5)
}
  0x3d   : > { %s4264_s1 = smov 4   ;;  %s4265_s10 = smov 64  }
  0x3e   : > { %3499 = dma.hbm_to_vmem [thread:$0]  (!%p4085_p7), %s415_s15, 128, %s417_s27, %s405_s16, %s4265_s10, %s4265_s10, %s4264_s1  }
  0x3f   : > { %428 = sbr.rel (%p3991_p3) target bundleno = 1688 (0x698), region = 64  ;;  %s4105_s23 = sand.u32 (!%p3991_p3), 1, %s3879_s18  }
  0x40   : > { %s2554_s3 = sshll.u32 (!%p3991_p3), %s4105_s23, 3  ;;  %s431_s6 = scalar_lea.sflag (!%p3991_p3), [#allocation4], %s4105_s23 }
  0x41   : > { %s4111_s21 = scalar_lea.vmem (!%p3991_p3), [#allocation3], %s2554_s3 }
  0x44   : > { %3854 = dma.done.wait (%p4064_p12), %s431_s6, 128  }
  0x45   : > { %3856 = vsyncadd (%p4064_p12), %s431_s6, 4294967168 }
  0x46   : > { %3858 = dma.done.wait (%p51_p1), [#allocation7], 4096  }
  0x47   : > { %3860 = vsyncadd (%p51_p1), [#allocation7], 4294963200 }
  0x48   : > { %3862 = dma.done.wait (%p51_p1), [#allocation10], 12480  }
  0x49   : > { %3864 = vsyncadd (%p51_p1), [#allocation10], 4294954816 }
  0x4a   : > { %3866 = dma.done.wait (%p51_p1), [#allocation13], 5120  }
  0x4b   : > { %3868 = vsyncadd (%p51_p1), [#allocation13], 4294962176  ;;  %v3899_v0 = vmov 0   ;;  %v3264_v1 = vld [vmem:[#allocation6 + $0x78] sm:$0xff]  ;;  %v3263_v3 = vld [vmem:[#allocation6 + $0x70] sm:$0xff]  ;;  %vm1719_vm1 = vcmask 130048  }
  0x4c   : > { %508 = vst [vmem:[#allocation2 + $0x4] sm:$0xf] %v3899_v0  ;;  %v3256_v2 = vld [vmem:[#allocation6 + $0x38] sm:$0xff]  ;;  %601 = vmatpush.bf16.msra.mxu0 %v3264_v1  ;;  %v3255_v4 = vld [vmem:[#allocation6 + $0x30] sm:$0xff]  ;;  %v3262_v5 = vld [vmem:[#allocation6 + $0x68] sm:$0xff]  ;;  %s4266_s28 = sld [smem:[#allocation25_spill]] }
  0x4d   : > { %686 = vmatpush.bf16.msra.mxu1 %v3256_v2  ;;  %v505_v6 = vld [vmem:[%s4111_s21] sm:$0xff]   ;;  %v3254_v7 = vld [vmem:[#allocation6 + $0x28] sm:$0xff]  ;;  %v3261_v10 = vld [vmem:[#allocation6 + $0x60] sm:$0xff]  ;;  %vm619_vm0 = vsmask.f32 4352  ;;  %s3417_s12 = sshll.u32 %s3986_s24, 3 }
  0x4e   : > { %509 = vst [vmem:[#allocation2 + $0x8] sm:$0xff] %v505_v6   ;;  %v3280_v8 = vld [vmem:[#allocation8 + $0x78] sm:$0xff]  ;;  %v3279_v9 = vld [vmem:[#allocation8 + $0x70] sm:$0xff]  ;;  %v3253_v11 = vld [vmem:[#allocation6 + $0x20] sm:$0xff]  ;;  %s4267_s6 = sld [smem:[#allocation26_spill]]  ;;  %s503_s25 = scalar_lea.vmem [#allocation15], %s2554_s3 }
  0x4f   : > { %802 = vmatpush.bf16.msra.mxu2 %v3280_v8  ;;  %v3260_v15 = vld [vmem:[#allocation6 + $0x58] sm:$0xff]  ;;  %v3259_v20 = vld [vmem:[#allocation6 + $0x50] sm:$0xff]  ;;  %v3258_v26 = vld [vmem:[#allocation6 + $0x48] sm:$0xff]  ;;  %s2408_s15 = sshll.u32 %s503_s25, 4  ;;  %s2396_s24 = scalar_lea.sflag [#allocation5], %s4105_s23  ;;  %s2409_s15 = int_to_ptr.vmem [resolvable:$true] %s2408_s15 }
  0x50   : > { %602 = vmatpush.bf16.msra.mxu0 %v3263_v3  ;;  %v3252_v16 = vld [vmem:[#allocation6 + $0x18] sm:$0xff]  ;;  %v3251_v21 = vld [vmem:[#allocation6 + $0x10] sm:$0xff]  ;;  %v3250_v27 = vld [vmem:[#allocation6 + $0x8] sm:$0xff] }
  0x51   : > { %687 = vmatpush.bf16.msra.mxu1 %v3255_v4  ;;  %v3257_v32 = vld [vmem:[#allocation6 + $0x40] sm:$0xff]  ;;  %v3278_v37 = vld [vmem:[#allocation8 + $0x68] sm:$0xff]  ;;  %v3276_v39 = vld [vmem:[#allocation8 + $0x58] sm:$0xff] }
  0x52   : > { %v3249_v33 = vld [vmem:[#allocation6] sm:$0xff]  ;;  %v3272_v40 = vld [vmem:[#allocation8 + $0x38] sm:$0xff]  ;;  %v3275_v41 = vld [vmem:[#allocation8 + $0x50] sm:$0xff] }
  0x53   : > { %v3439_v12 = vld [vmem:[#allocation2 + $0x4] sm:$0x8]  ;;  %803 = vmatpush.bf16.msra.mxu2 %v3279_v9  ;;  %886 = vmatpush.bf16.msra.mxu3 %v3272_v40  ;;  %v3271_v42 = vld [vmem:[#allocation8 + $0x30] sm:$0xff]  ;;  %v3274_v43 = vld [vmem:[#allocation8 + $0x48] sm:$0xff] }
  0x54   : > { %603 = vmatpush.bf16.msra.mxu0 %v3262_v5  ;;  %v3277_v38 = vld [vmem:[#allocation8 + $0x60] sm:$0xff]  ;;  %v3270_v44 = vld [vmem:[#allocation8 + $0x28] sm:$0xff]  ;;  %v3268_v47 = vld [vmem:[#allocation8 + $0x18] sm:$0xff]  ;;  %s3829_s3 = scalar_lea.hbm %s4267_s6, 16 }
  0x55   : > { %688 = vmatpush.bf16.msra.mxu1 %v3254_v7  ;;  %v3436_v13 = vld [vmem:[#allocation2 + $0x8] sm:$0xff]   ;;  %v3273_v45 = vld [vmem:[#allocation8 + $0x40] sm:$0xff]  ;;  %v3267_v48 = vld [vmem:[#allocation8 + $0x10] sm:$0xff] }
  0x56   : > { %v3447_v14 = vld [vmem:[#allocation2 + $0x4] sm:$0xf0]   ;;  %v3421_v17 = vunpack.c.h.b16 %v3436_v13  ;;  %v3269_v46 = vld [vmem:[#allocation8 + $0x20] sm:$0xff]  ;;  %v3371_v54 = vld [vmem:[#allocation9 + $0x2cc] sm:$0xf0] }
  0x57   : > { %v3440_v18 = vor.u32 %v3447_v14, %v3439_v12  ;;  %804 = vmatpush.bf16.msra.mxu2 %v3278_v37  ;;  %887 = vmatpush.bf16.msra.mxu3 %v3271_v42  ;;  %v3266_v49 = vld [vmem:[#allocation8 + $0x8] sm:$0xff]  ;;  %v3265_v50 = vld [vmem:[#allocation8] sm:$0xff]  ;;  %v3030_v57 = vld [vmem:[#allocation9 + $0x2d0] sm:$0xf0] }
  0x58   : > { %604 = vmatpush.bf16.msra.mxu0 %v3261_v10  ;;  %v618_v19 = vpack.c.b16 %v3421_v17, %v3421_v17  ;;  %v3028_v53 = vld [vmem:[#allocation9 + $0x2a0] sm:$0xf]  ;;  %v3365_v55 = vld [vmem:[#allocation9 + $0x2a4] sm:$0xf]  ;;  %v3036_v58 = vld [vmem:[#allocation9 + $0x2a8] sm:$0xf] }
  0x59   : > { %689 = vmatpush.bf16.msra.mxu1 %v3253_v11  ;;  %v621_v24 = vshrl.u32 %v3440_v18, 16  ;;  %v624_v25 = vshll.u32 %v3440_v18, 16  ;;  %v3029_v56 = vor.u32 %v3371_v54, %v3028_v53  ;;  %v3372_v59 = vld [vmem:[#allocation9 + $0x2d4] sm:$0xf0]  ;;  %v3033_v60 = vor.u32 %v3365_v55, %v3030_v57  ;;  %v3366_v62 = vld [vmem:[#allocation9 + $0x2ac] sm:$0xf] }
  0x5a   : > { %v629_v22 = vshrl.u32 %v618_v19, 16  ;;  %v632_v23 = vshll.u32 %v618_v19, 16  ;;  %v3037_v61 = vor.u32 %v3372_v59, %v3036_v58  ;;  %v3038_v63 = vld [vmem:[#allocation9 + $0x2d8] sm:$0xf0]  ;;  %v2980_v0 = vld [vmem:[#allocation9 + $0x240] sm:$0xf] }
  0x5b   : > { %v623_v28 = vrot.slane %v621_v24, 3  ;;  %v626_v29 = vrot.slane %v624_v25, 4  ;;  %805 = vmatpush.bf16.msra.mxu2 %v3277_v38  ;;  %888 = vmatpush.bf16.msra.mxu3 %v3270_v44  ;;  %v3563_v2 = vld [vmem:[%s4234_s2] ss:$0 sm:$0xff]  ;;  %v3041_v3 = vor.u32 %v3366_v62, %v3038_v63  ;;  %v3359_v4 = vld [vmem:[#allocation9 + $0x26c] sm:$0xf0] }
  0x5c   : > { %605 = vmatpush.bf16.msra.mxu0 %v3260_v15  ;;  %v631_v30 = vrot.slane %v629_v22, 3  ;;  %v634_v31 = vrot.slane %v632_v23, 4  ;;  %v3353_v5 = vld [vmem:[#allocation9 + $0x244] sm:$0xf]  ;;  %v2981_v6 = vor.u32 %v3359_v4, %v2980_v0  ;;  %v2982_v7 = vld [vmem:[#allocation9 + $0x270] sm:$0xf0] }
  0x5d   : > { %690 = vmatpush.bf16.msra.mxu1 %v3252_v16  ;;  %v627_v34 = vor.u32 %v626_v29, %v623_v28  ;;  %v2988_v8 = vld [vmem:[#allocation9 + $0x248] sm:$0xf]  ;;  %v3360_v9 = vld [vmem:[#allocation9 + $0x274] sm:$0xf0]  ;;  %v2985_v10 = vor.u32 %v3353_v5, %v2982_v7  ;;  %v3354_v12 = vld [vmem:[#allocation9 + $0x24c] sm:$0xf] }
  0x5e   : > { %v635_v35 = vor.u32 %v634_v31, %v631_v30  ;;  %v2989_v11 = vor.u32 %v3360_v9, %v2988_v8  ;;  %v2932_v14 = vld [vmem:[#allocation9 + $0x1e0] sm:$0xf]  ;;  %v3347_v18 = vld [vmem:[#allocation9 + $0x20c] sm:$0xf0]  ;;  %v3341_v19 = vld [vmem:[#allocation9 + $0x1e4] sm:$0xf] }
  0x5f   : > { %806 = vmatpush.bf16.msra.mxu2 %v3276_v39  ;;  %889 = vmatpush.bf16.msra.mxu3 %v3269_v46  ;;  %v2933_v23 = vor.u32 %v3347_v18, %v2932_v14  ;;  %v2940_v24 = vld [vmem:[#allocation9 + $0x1e8] sm:$0xf]  ;;  %v3348_v25 = vld [vmem:[#allocation9 + $0x214] sm:$0xf0]  ;;  %v2942_v29 = vld [vmem:[#allocation9 + $0x218] sm:$0xf0] }
  0x60   : > { %606 = vmatpush.bf16.msra.mxu0 %v3259_v20  ;;  %v636_v36 = vsel %vm619_vm0, %v627_v34, %v635_v35  ;;  %v2934_v20 = vld [vmem:[#allocation9 + $0x210] sm:$0xf0]  ;;  %v2941_v28 = vor.u32 %v3348_v25, %v2940_v24  ;;  %v2884_v30 = vld [vmem:[#allocation9 + $0x180] sm:$0xf]  ;;  %v3335_v31 = vld [vmem:[#allocation9 + $0x1ac] sm:$0xf0] }
  0x61   : > { %691 = vmatpush.bf16.msra.mxu1 %v3251_v21  ;;  %v3329_v34 = vld [vmem:[#allocation9 + $0x184] sm:$0xf]  ;;  %v2886_v35 = vld [vmem:[#allocation9 + $0x1b0] sm:$0xf0]  ;;  %v3336_v37 = vld [vmem:[#allocation9 + $0x1b4] sm:$0xf0]  ;;  %v2885_v42 = vor.u32 %v3335_v31, %v2884_v30 }
  0x62   : > { %v3330_v38 = vld [vmem:[#allocation9 + $0x18c] sm:$0xf]  ;;  %v2894_v39 = vld [vmem:[#allocation9 + $0x1b8] sm:$0xf0]  ;;  %v3323_v46 = vld [vmem:[#allocation9 + $0x14c] sm:$0xf0] }
  0x63   : > { %807 = vmatpush.bf16.msra.mxu2 %v3275_v41  ;;  %890 = vmatpush.bf16.msra.mxu3 %v3268_v47  ;;  %v3317_v47 = vld [vmem:[#allocation9 + $0x124] sm:$0xf]  ;;  %v3318_v53 = vld [vmem:[#allocation9 + $0x12c] sm:$0xf]  ;;  %v2846_v54 = vld [vmem:[#allocation9 + $0x158] sm:$0xf0] }
  0x64   : > { %607 = vmatpush.bf16.msra.mxu0 %v3258_v26  ;;  %v3342_v26 = vld [vmem:[#allocation9 + $0x1ec] sm:$0xf]  ;;  %v2788_v59 = vld [vmem:[#allocation9 + $0xc0] sm:$0xf]  ;;  %v2849_v63 = vor.u32 %v3318_v53, %v2846_v54  ;;  %v2790_v0 = vld [vmem:[#allocation9 + $0xf0] sm:$0xf0] }
  0x65   : > { %692 = vmatpush.bf16.msra.mxu1 %v3250_v27  ;;  %v2937_v27 = vor.u32 %v3341_v19, %v2934_v20  ;;  %v2798_v4 = vld [vmem:[#allocation9 + $0xf8] sm:$0xf0]  ;;  %v3445_v5 = vld [vmem:[#allocation2 + $0x4] sm:$0x8]  ;;  %v2740_v7 = vld [vmem:[#allocation9 + $0x60] sm:$0xf] }
  0x66   : > { %v3294_v19 = vld [vmem:[#allocation9 + $0x6c] sm:$0xf]  ;;  %v2750_v20 = vld [vmem:[#allocation9 + $0x98] sm:$0xf0]  ;;  %v3374_v53 = vld [vmem:[#allocation9 + $0x2e4] sm:$0xf0] }
  0x67   : > { %808 = vmatpush.bf16.msra.mxu2 %v3274_v43  ;;  %891 = vmatpush.bf16.msra.mxu3 %v3267_v48  ;;  %v2889_v43 = vor.u32 %v3329_v34, %v2886_v35  ;;  %v2700_v34 = vld [vmem:[#allocation9 + $0x8] sm:$0xf]  ;;  %v3288_v35 = vld [vmem:[#allocation9 + $0x34] sm:$0xf0] }
  0x68   : > { %608 = vmatpush.bf16.msra.mxu0 %v3257_v32 }
  0x69   : > { %693 = vmatpush.bf16.msra.mxu1 %v3249_v33  ;;  %v2945_v33 = vor.u32 %v3342_v26, %v2942_v29  ;;  %v3281_v29 = vld [vmem:[#allocation9 + $0x4] sm:$0xf] }
  0x6b   : > { %609 = vmatmul.bf16.vlgmr.msra.gmra.mxu0 %v3436_v13  ;;  %809 = vmatpush.bf16.msra.mxu2 %v3273_v45  ;;  %v2990_v13 = vld [vmem:[#allocation9 + $0x278] sm:$0xf0]  ;;  %v2836_v45 = vld [vmem:[#allocation9 + $0x120] sm:$0xf] }
  0x6c   : > { %694 = vmatmul.bf16.vlgmr.msra.gmra.mxu1 %v636_v36  ;;  %892 = vmatpush.bf16.msra.mxu3 %v3266_v49  ;;  %v2993_v17 = vor.u32 %v3354_v12, %v2990_v13  ;;  %v2892_v36 = vld [vmem:[#allocation9 + $0x188] sm:$0xf]  ;;  %v2897_v49 = vor.u32 %v3330_v38, %v2894_v39  ;;  %v3299_v12 = vld [vmem:[#allocation9 + $0x8c] sm:$0xf0]  ;;  %v3293_v13 = vld [vmem:[#allocation9 + $0x64] sm:$0xf] }
  0x6d   : > { %1513 = vmatpush.bf16.msrb.mxu0 %v3029_v56  ;;  %1527 = vmatpush.bf16.msrb.mxu1 %v3033_v60  ;;  %v2893_v44 = vor.u32 %v3336_v37, %v2892_v36  ;;  %v2837_v56 = vor.u32 %v3323_v46, %v2836_v45  ;;  %v3311_v60 = vld [vmem:[#allocation9 + $0xec] sm:$0xf0]  ;;  %v3282_v36 = vld [vmem:[#allocation9 + $0xc] sm:$0xf]  ;;  %v2702_v37 = vld [vmem:[#allocation9 + $0x38] sm:$0xf0] }
  0x6e   : > { %v2705_v45 = vor.u32 %v3282_v36, %v2702_v37  ;;  %v2860_v36 = vld [vmem:[#allocation9 + $0x138] sm:$0xf]  ;;  %v3326_v37 = vld [vmem:[#allocation9 + $0x164] sm:$0xf0] }
  0x6f   : > { %1541 = vmatpush.bf16.msrb.mxu2 %v3037_v61  ;;  %v3305_v61 = vld [vmem:[#allocation9 + $0xc4] sm:$0xf] }
  0x70   : > { %893 = vmatpush.bf16.msra.mxu3 %v3265_v50  ;;  %v2838_v50 = vld [vmem:[#allocation9 + $0x150] sm:$0xf0] }
  0x71   : > { %1514 = vmatpush.bf16.msrb.mxu0 %v2981_v6  ;;  %1528 = vmatpush.bf16.msrb.mxu1 %v2985_v10  ;;  %v2841_v57 = vor.u32 %v3317_v47, %v2838_v50  ;;  %v2789_v6 = vor.u32 %v3311_v60, %v2788_v59  ;;  %v2793_v10 = vor.u32 %v3305_v61, %v2790_v0  ;;  %v3044_v47 = vld [vmem:[#allocation9 + $0x2b0] sm:$0xf]  ;;  %v3361_v60 = vld [vmem:[#allocation9 + $0x27c] sm:$0xf0]  ;;  %v3355_v61 = vld [vmem:[#allocation9 + $0x254] sm:$0xf] }
  0x73   : > { %1542 = vmatpush.bf16.msrb.mxu2 %v2989_v11 }
  0x74   : > { %1555 = vmatpush.bf16.msrb.mxu3 %v3041_v3  ;;  %v3306_v3 = vld [vmem:[#allocation9 + $0xcc] sm:$0xf] }
  0x75   : > { %1515 = vmatpush.bf16.msrb.mxu0 %v2933_v23  ;;  %1529 = vmatpush.bf16.msrb.mxu1 %v2937_v27  ;;  %v2801_v14 = vor.u32 %v3306_v3, %v2798_v4  ;;  %v2692_v23 = vld [vmem:[#allocation9] sm:$0xf]  ;;  %v3356_v3 = vld [vmem:[#allocation9 + $0x25c] sm:$0xf] }
  0x77   : > { %1543 = vmatpush.bf16.msrb.mxu2 %v2941_v28  ;;  %v3287_v28 = vld [vmem:[#allocation9 + $0x2c] sm:$0xf0] }
  0x78   : > { %1556 = vmatpush.bf16.msrb.mxu3 %v2993_v17  ;;  %v3300_v17 = vld [vmem:[#allocation9 + $0x94] sm:$0xf0] }
  0x79   : > { %1516 = vmatpush.bf16.msrb.mxu0 %v2885_v42  ;;  %1530 = vmatpush.bf16.msrb.mxu1 %v2889_v43 }
  0x7b   : > { %1544 = vmatpush.bf16.msrb.mxu2 %v2893_v44  ;;  %v2701_v44 = vor.u32 %v3288_v35, %v2700_v34  ;;  %v2854_v35 = vld [vmem:[#allocation9 + $0x160] sm:$0xf0] }
  0x7c   : > { %1557 = vmatpush.bf16.msrb.mxu3 %v2945_v33  ;;  %v2694_v33 = vld [vmem:[#allocation9 + $0x30] sm:$0xf0] }
  0x7d   : > { %1517 = vmatpush.bf16.msrb.mxu0 %v2837_v56  ;;  %1531 = vmatpush.bf16.msrb.mxu1 %v2841_v57  ;;  %v3368_v56 = vld [vmem:[#allocation9 + $0x2bc] sm:$0xf]  ;;  %v3054_v57 = vld [vmem:[#allocation9 + $0x2e8] sm:$0xf0] }
  0x7e   : > { %v3057_v59 = vor.u32 %v3368_v56, %v3054_v57  ;;  %v3301_v56 = vld [vmem:[#allocation9 + $0x9c] sm:$0xf0]  ;;  %v3295_v57 = vld [vmem:[#allocation9 + $0x74] sm:$0xf] }
  0x80   : > { %1558 = vmatpush.bf16.msrb.mxu3 %v2897_v49  ;;  %v3367_v49 = vld [vmem:[#allocation9 + $0x2b4] sm:$0xf] }
  0x81   : > { %1518 = vmatpush.bf16.msrb.mxu0 %v2789_v6  ;;  %1532 = vmatpush.bf16.msrb.mxu1 %v2793_v10 }
  0x84   : > { %1559 = vmatpush.bf16.msrb.mxu3 %v2849_v63 }
  0x88   : > { %1560 = vmatpush.bf16.msrb.mxu3 %v2801_v14 }
  0xe8   : > { %v610_v51 = vpop.f32.mrf.mxu0 }
  0xe9   : > { %v695_v52 = vpop.f32.mrf.mxu1 }
  0xea   : > { %v696_v1 = vadd.f32 %v695_v52, %v610_v51  ;;  %v2844_v51 = vld [vmem:[#allocation9 + $0x128] sm:$0xf]  ;;  %v3324_v52 = vld [vmem:[#allocation9 + $0x154] sm:$0xf0] }
  0xeb   : > { %v2845_v58 = vor.u32 %v3324_v52, %v2844_v51  ;;  %v3046_v51 = vld [vmem:[#allocation9 + $0x2e0] sm:$0xf0]  ;;  %v3052_v52 = vld [vmem:[#allocation9 + $0x2b8] sm:$0xf] }
  0xec   : > { %v704_v21 = vadd.f32 %v3563_v2, %v696_v1  ;;  %v2796_v1 = vld [vmem:[#allocation9 + $0xc8] sm:$0xf]  ;;  %v3049_v54 = vor.u32 %v3367_v49, %v3046_v51 }
  0xed   : > { %1545 = vmatpush.bf16.msrb.mxu2 %v2845_v58  ;;  %v2996_v58 = vld [vmem:[#allocation9 + $0x250] sm:$0xf]  ;;  %v3314_v49 = vld [vmem:[#allocation9 + $0x104] sm:$0xf0] }
  0xee   : > { %v706_v40 = vmax.f32 %v704_v21, 0.0  ;;  %v2997_v63 = vor.u32 %v3361_v60, %v2996_v58  ;;  %v2764_v60 = vld [vmem:[#allocation9 + $0x78] sm:$0xf] }
  0xf0   : > { %v612_v15 = vpop.f32.mrf.mxu0 }
  0xf1   : > { %v697_v16 = vpop.f32.mrf.mxu1 }
  0xf2   : > { %v698_v22 = vadd.f32 %v697_v16, %v612_v15  ;;  %v2742_v15 = vld [vmem:[#allocation9 + $0x90] sm:$0xf0]  ;;  %v2748_v16 = vld [vmem:[#allocation9 + $0x68] sm:$0xf] }
  0xf3   : > { %v2745_v26 = vor.u32 %v3293_v13, %v2742_v15  ;;  %v2749_v27 = vor.u32 %v3300_v17, %v2748_v16  ;;  %v3350_v13 = vld [vmem:[#allocation9 + $0x224] sm:$0xf0]  ;;  %v3344_v16 = vld [vmem:[#allocation9 + $0x1fc] sm:$0xf]  ;;  %v2958_v17 = vld [vmem:[#allocation9 + $0x228] sm:$0xf0] }
  0xf4   : > { %v705_v32 = vadd.f32 %v3563_v2, %v698_v22  ;;  %v3312_v2 = vld [vmem:[#allocation9 + $0xf4] sm:$0xf0]  ;;  %v2741_v22 = vor.u32 %v3299_v12, %v2740_v7  ;;  %v2948_v7 = vld [vmem:[#allocation9 + $0x1f0] sm:$0xf] }
  0xf5   : > { %v2797_v11 = vor.u32 %v3312_v2, %v2796_v1  ;;  %1533 = vmatpush.bf16.msrb.mxu1 %v2745_v26  ;;  %v3004_v1 = vld [vmem:[#allocation9 + $0x258] sm:$0xf]  ;;  %v3362_v2 = vld [vmem:[#allocation9 + $0x284] sm:$0xf0] }
  0xf6   : > { %v707_v41 = vmax.f32 %v705_v32, 0.0  ;;  %v2753_v32 = vor.u32 %v3294_v19, %v2750_v20  ;;  %1519 = vmatpush.bf16.msrb.mxu0 %v2741_v22  ;;  %v3005_v4 = vor.u32 %v3362_v2, %v3004_v1  ;;  %v2956_v12 = vld [vmem:[#allocation9 + $0x1f8] sm:$0xf]  ;;  %v2900_v19 = vld [vmem:[#allocation9 + $0x190] sm:$0xf] }
  0xf7   : > { %1546 = vmatpush.bf16.msrb.mxu2 %v2797_v11  ;;  %v2950_v11 = vld [vmem:[#allocation9 + $0x220] sm:$0xf0]  ;;  %v2957_v15 = vor.u32 %v3350_v13, %v2956_v12  ;;  %v3337_v20 = vld [vmem:[#allocation9 + $0x1bc] sm:$0xf0]  ;;  %v2766_v1 = vld [vmem:[#allocation9 + $0xa8] sm:$0xf0] }
  0xf8   : > { %v3425_v48 = vpack.c.bf16 %v707_v41, %v706_v40  ;;  %v2693_v40 = vor.u32 %v3287_v28, %v2692_v23  ;;  %v2697_v41 = vor.u32 %v3281_v29, %v2694_v33  ;;  %1561 = vmatpush.bf16.msrb.mxu3 %v2753_v32  ;;  %v2901_v22 = vor.u32 %v3337_v20, %v2900_v19  ;;  %v2902_v23 = vld [vmem:[#allocation9 + $0x1c0] sm:$0xf0]  ;;  %v3332_v28 = vld [vmem:[#allocation9 + $0x19c] sm:$0xf]  ;;  %v2910_v29 = vld [vmem:[#allocation9 + $0x1c8] sm:$0xf0] }
  0xf9   : > { %v3325_v32 = vld [vmem:[#allocation9 + $0x15c] sm:$0xf0]  ;;  %v3319_v33 = vld [vmem:[#allocation9 + $0x134] sm:$0xf]  ;;  %v3284_v12 = vld [vmem:[#allocation9 + $0x1c] sm:$0xf] }
  0xfa   : > { %3441 = vst [vmem:[#allocation2 + $0x8] sm:$0xff] %v3425_v48   ;;  %v3430_v55 = vunpack.c.h.b16 %v3425_v48  ;;  %810 = vmatmul.bf16.vlgmr.msra.gmra.mxu2 %v3425_v48  ;;  %1520 = vmatpush.bf16.msrb.mxu0 %v2693_v40  ;;  %v3373_v48 = vld [vmem:[#allocation9 + $0x2dc] sm:$0xf0]  ;;  %v3320_v40 = vld [vmem:[#allocation9 + $0x13c] sm:$0xf] }
  0xfb   : > { %1547 = vmatpush.bf16.msrb.mxu2 %v2749_v27  ;;  %1534 = vmatpush.bf16.msrb.mxu1 %v2697_v41  ;;  %v3045_v50 = vor.u32 %v3373_v48, %v3044_v47  ;;  %v2862_v41 = vld [vmem:[#allocation9 + $0x168] sm:$0xf0]  ;;  %v2806_v47 = vld [vmem:[#allocation9 + $0x100] sm:$0xf0]  ;;  %v2812_v48 = vld [vmem:[#allocation9 + $0xd8] sm:$0xf] }
  0xfc   : > { %v819_v62 = vpack.c.b16 %v3430_v55, %v3430_v55  ;;  %1562 = vmatpush.bf16.msrb.mxu3 %v2705_v45  ;;  %v3053_v55 = vor.u32 %v3374_v53, %v3052_v52  ;;  %v3307_v45 = vld [vmem:[#allocation9 + $0xd4] sm:$0xf]  ;;  %v2813_v51 = vor.u32 %v3314_v49, %v2812_v48  ;;  %v3308_v52 = vld [vmem:[#allocation9 + $0xdc] sm:$0xf]  ;;  %v2814_v53 = vld [vmem:[#allocation9 + $0x108] sm:$0xf0] }
  0xfd   : > { %v2718_v13 = vld [vmem:[#allocation9 + $0x48] sm:$0xf0]  ;;  %v2964_v49 = vld [vmem:[#allocation9 + $0x200] sm:$0xf] }
  0xfe   : > { %v829_v8 = vshrl.u32 %v819_v62, 16  ;;  %v832_v9 = vshll.u32 %v819_v62, 16  ;;  %1569 = vmatpush.bf16.msra.mxu0 %v3045_v50  ;;  %v2998_v62 = vld [vmem:[#allocation9 + $0x280] sm:$0xf0]  ;;  %v2809_v50 = vor.u32 %v3307_v45, %v2806_v47  ;;  %v3358_v45 = vld [vmem:[#allocation9 + $0x26c] sm:$0xf] }
  0xff   : > { %1548 = vmatpush.bf16.msrb.mxu2 %v2701_v44  ;;  %1583 = vmatpush.bf16.msra.mxu1 %v3049_v54  ;;  %v3001_v0 = vor.u32 %v3355_v61, %v2998_v62  ;;  %v3313_v44 = vld [vmem:[#allocation9 + $0xfc] sm:$0xf0]  ;;  %v2817_v54 = vor.u32 %v3308_v52, %v2814_v53  ;;  %v3302_v61 = vld [vmem:[#allocation9 + $0xa4] sm:$0xf0]  ;;  %v3345_v53 = vld [vmem:[#allocation9 + $0x204] sm:$0xf] }
 0x100   : > { %v831_v24 = vrot.slane %v829_v8, 3  ;;  %v834_v25 = vrot.slane %v832_v9, 4  ;;  %v3349_v8 = vld [vmem:[#allocation9 + $0x21c] sm:$0xf0]  ;;  %v3343_v9 = vld [vmem:[#allocation9 + $0x1f4] sm:$0xf] }
 0x101   : > { %v3448_v18 = vld [vmem:[#allocation2 + $0x4] sm:$0xf0]   ;;  %v2949_v10 = vor.u32 %v3349_v8, %v2948_v7  ;;  %v2953_v14 = vor.u32 %v3343_v9, %v2950_v11  ;;  %v2710_v7 = vld [vmem:[#allocation9 + $0x40] sm:$0xf0]  ;;  %v2716_v8 = vld [vmem:[#allocation9 + $0x18] sm:$0xf] }
 0x102   : > { %v3446_v21 = vor.u32 %v3448_v18, %v3445_v5  ;;  %v835_v43 = vor.u32 %v834_v25, %v831_v24  ;;  %v3006_v5 = vld [vmem:[#allocation9 + $0x288] sm:$0xf0]  ;;  %1570 = vmatpush.bf16.msra.mxu0 %v2997_v63  ;;  %v2961_v18 = vor.u32 %v3344_v16, %v2958_v17  ;;  %v2908_v24 = vld [vmem:[#allocation9 + $0x198] sm:$0xf]  ;;  %v3338_v25 = vld [vmem:[#allocation9 + $0x1c4] sm:$0xf0]  ;;  %v2765_v63 = vor.u32 %v3302_v61, %v2764_v60 }
 0x103   : > { %1597 = vmatpush.bf16.msra.mxu2 %v3053_v55  ;;  %v3009_v6 = vor.u32 %v3356_v3, %v3006_v5  ;;  %1584 = vmatpush.bf16.msra.mxu1 %v3001_v0  ;;  %v2909_v27 = vor.u32 %v3338_v25, %v2908_v24  ;;  %v2756_v55 = vld [vmem:[#allocation9 + $0x70] sm:$0xf]  ;;  %v3296_v0 = vld [vmem:[#allocation9 + $0x7c] sm:$0xf]  ;;  %v3283_v5 = vld [vmem:[#allocation9 + $0x14] sm:$0xf] }
 0x104   : > { %v821_v30 = vshrl.u32 %v3446_v21, 16  ;;  %v824_v31 = vshll.u32 %v3446_v21, 16  ;;  %v3331_v21 = vld [vmem:[#allocation9 + $0x194] sm:$0xf]  ;;  %v2757_v58 = vor.u32 %v3301_v56, %v2756_v55  ;;  %v2769_v2 = vor.u32 %v3296_v0, %v2766_v1  ;;  %v2708_v3 = vld [vmem:[#allocation9 + $0x10] sm:$0xf] }
 0x105   : > { %v2905_v26 = vor.u32 %v3331_v21, %v2902_v23  ;;  %v3290_v9 = vld [vmem:[#allocation9 + $0x44] sm:$0xf0]  ;;  %v3060_v24 = vld [vmem:[#allocation9 + $0x2c0] sm:$0xf]  ;;  %v3375_v25 = vld [vmem:[#allocation9 + $0x2ec] sm:$0xf0] }
 0x106   : > { %v823_v38 = vrot.slane %v821_v30, 3  ;;  %v826_v39 = vrot.slane %v824_v31, 4  ;;  %1571 = vmatpush.bf16.msra.mxu0 %v2949_v10  ;;  %v2913_v30 = vor.u32 %v3332_v28, %v2910_v29  ;;  %v2852_v31 = vld [vmem:[#allocation9 + $0x130] sm:$0xf]  ;;  %v2713_v10 = vor.u32 %v3283_v5, %v2710_v7  ;;  %v3068_v28 = vld [vmem:[#allocation9 + $0x2c8] sm:$0xf] }
 0x107   : > { %1598 = vmatpush.bf16.msra.mxu2 %v3005_v4  ;;  %1585 = vmatpush.bf16.msra.mxu1 %v2953_v14  ;;  %v2853_v34 = vor.u32 %v3325_v32, %v2852_v31  ;;  %v3289_v4 = vld [vmem:[#allocation9 + $0x3c] sm:$0xf0]  ;;  %v2717_v11 = vor.u32 %v3290_v9, %v2716_v8  ;;  %v2721_v14 = vor.u32 %v3284_v12, %v2718_v13  ;;  %v3376_v29 = vld [vmem:[#allocation9 + $0x2f4] sm:$0xf0]  ;;  %v3370_v32 = vld [vmem:[#allocation9 + $0x2cc] sm:$0xf] }
 0x108   : > { %v827_v42 = vor.u32 %v826_v39, %v823_v38  ;;  %v2857_v38 = vor.u32 %v3319_v33, %v2854_v35  ;;  %v2861_v39 = vor.u32 %v3326_v37, %v2860_v36  ;;  %v3070_v33 = vld [vmem:[#allocation9 + $0x2f8] sm:$0xf0]  ;;  %v3061_v35 = vor.u32 %v3375_v25, %v3060_v24  ;;  %v3012_v37 = vld [vmem:[#allocation9 + $0x260] sm:$0xf]  ;;  %v2972_v55 = vld [vmem:[#allocation9 + $0x208] sm:$0xf] }
 0x109   : > { %v3352_v56 = vld [vmem:[#allocation9 + $0x234] sm:$0xf0]  ;;  %v2916_v61 = vld [vmem:[#allocation9 + $0x1a0] sm:$0xf]  ;;  %v3333_v1 = vld [vmem:[#allocation9 + $0x1a4] sm:$0xf] }
 0x10a   : > { %v836_v46 = vsel %vm619_vm0, %v827_v42, %v835_v43  ;;  %1572 = vmatpush.bf16.msra.mxu0 %v2901_v22  ;;  %v2865_v42 = vor.u32 %v3320_v40, %v2862_v41  ;;  %v2804_v43 = vld [vmem:[#allocation9 + $0xd0] sm:$0xf]  ;;  %v3073_v40 = vor.u32 %v3370_v32, %v3070_v33  ;;  %v3357_v41 = vld [vmem:[#allocation9 + $0x264] sm:$0xf]  ;;  %v3334_v5 = vld [vmem:[#allocation9 + $0x1ac] sm:$0xf] }
 0x10b   : > { %894 = vmatmul.bf16.vlgmr.msra.gmra.mxu3 %v836_v46  ;;  %1599 = vmatpush.bf16.msra.mxu2 %v2957_v15  ;;  %v2805_v46 = vor.u32 %v3313_v44, %v2804_v43  ;;  %v3020_v43 = vld [vmem:[#allocation9 + $0x268] sm:$0xf]  ;;  %v3364_v44 = vld [vmem:[#allocation9 + $0x294] sm:$0xf0]  ;;  %v2868_v9 = vld [vmem:[#allocation9 + $0x140] sm:$0xf] }
 0x10c   : > { %1611 = vmatpush.bf16.msra.mxu3 %v3057_v59  ;;  %1586 = vmatpush.bf16.msra.mxu1 %v2905_v26  ;;  %v2758_v59 = vld [vmem:[#allocation9 + $0xa0] sm:$0xf0]  ;;  %v2772_v33 = vld [vmem:[#allocation9 + $0x80] sm:$0xf] }
 0x10d   : > { %v2761_v62 = vor.u32 %v3295_v57, %v2758_v59  ;;  %v3369_v26 = vld [vmem:[#allocation9 + $0x2c4] sm:$0xf]  ;;  %v3346_v57 = vld [vmem:[#allocation9 + $0x20c] sm:$0xf] }
 0x10e   : > { %1573 = vmatpush.bf16.msra.mxu0 %v2853_v34  ;;  %v3321_v13 = vld [vmem:[#allocation9 + $0x144] sm:$0xf] }
 0x10f   : > { %1600 = vmatpush.bf16.msra.mxu2 %v2909_v27  ;;  %v3062_v27 = vld [vmem:[#allocation9 + $0x2f0] sm:$0xf0]  ;;  %v3309_v25 = vld [vmem:[#allocation9 + $0xe4] sm:$0xf] }
 0x110   : > { %1612 = vmatpush.bf16.msra.mxu3 %v3009_v6  ;;  %1587 = vmatpush.bf16.msra.mxu1 %v2857_v38  ;;  %v2709_v6 = vor.u32 %v3289_v4, %v2708_v3  ;;  %v3065_v36 = vor.u32 %v3369_v26, %v3062_v27  ;;  %v3363_v38 = vld [vmem:[#allocation9 + $0x28c] sm:$0xf0]  ;;  %v2924_v3 = vld [vmem:[#allocation9 + $0x1a8] sm:$0xf]  ;;  %v3340_v4 = vld [vmem:[#allocation9 + $0x1d4] sm:$0xf0] }
 0x111   : > { %v3013_v47 = vor.u32 %v3363_v38, %v3012_v37  ;;  %v2822_v26 = vld [vmem:[#allocation9 + $0x110] sm:$0xf0]  ;;  %v2828_v27 = vld [vmem:[#allocation9 + $0xe8] sm:$0xf]  ;;  %v3297_v38 = vld [vmem:[#allocation9 + $0x84] sm:$0xf] }
 0x112   : > { %1574 = vmatpush.bf16.msra.mxu0 %v2805_v46  ;;  %v3022_v46 = vld [vmem:[#allocation9 + $0x298] sm:$0xf0]  ;;  %v2825_v32 = vor.u32 %v3309_v25, %v2822_v26 }
 0x113   : > { %1601 = vmatpush.bf16.msra.mxu2 %v2861_v39  ;;  %v3069_v39 = vor.u32 %v3376_v29, %v3068_v28  ;;  %v3025_v52 = vor.u32 %v3358_v45, %v3022_v46  ;;  %v3316_v28 = vld [vmem:[#allocation9 + $0x114] sm:$0xf0]  ;;  %v3310_v29 = vld [vmem:[#allocation9 + $0xec] sm:$0xf]  ;;  %v2724_v46 = vld [vmem:[#allocation9 + $0x20] sm:$0xf] }
 0x114   : > { %1613 = vmatpush.bf16.msra.mxu3 %v2961_v18  ;;  %1588 = vmatpush.bf16.msra.mxu1 %v2809_v50  ;;  %v3564_v18 = vld [vmem:[%s4236_s4] ss:$0 sm:$0xff]  ;;  %v3351_v50 = vld [vmem:[#allocation9 + $0x22c] sm:$0xf0] }
 0x115   : > { %v2965_v59 = vor.u32 %v3351_v50, %v2964_v49  ;;  %v3285_v50 = vld [vmem:[#allocation9 + $0x24] sm:$0xf] }
 0x116   : > { %1575 = vmatpush.bf16.msra.mxu0 %v2757_v58  ;;  %v2974_v58 = vld [vmem:[#allocation9 + $0x238] sm:$0xf0] }
 0x117   : > { %1602 = vmatpush.bf16.msra.mxu2 %v2813_v51  ;;  %v3021_v51 = vor.u32 %v3364_v44, %v3020_v43  ;;  %v2977_v0 = vor.u32 %v3346_v57, %v2974_v58  ;;  %v2782_v43 = vld [vmem:[#allocation9 + $0xb8] sm:$0xf0] }
 0x118   : > { %1614 = vmatpush.bf16.msra.mxu3 %v2913_v30  ;;  %1589 = vmatpush.bf16.msra.mxu1 %v2761_v62  ;;  %v3339_v62 = vld [vmem:[#allocation9 + $0x1cc] sm:$0xf0] }
 0x119   : > { %v2917_v7 = vor.u32 %v3339_v62, %v2916_v61  ;;  %v1005_v62 = vld [vmem:[#allocation11] sm:$0xff] }
 0x11a   : > { %1576 = vmatpush.bf16.msra.mxu0 %v2709_v6  ;;  %v2926_v6 = vld [vmem:[#allocation9 + $0x1d8] sm:$0xf0] }
 0x11b   : > { %1603 = vmatpush.bf16.msra.mxu2 %v2765_v63  ;;  %v2973_v63 = vor.u32 %v3352_v56, %v2972_v55  ;;  %v2929_v12 = vor.u32 %v3334_v5, %v2926_v6  ;;  %v2734_v55 = vld [vmem:[#allocation9 + $0x58] sm:$0xf0] }
 0x11c   : > { %1615 = vmatpush.bf16.msra.mxu3 %v2865_v42  ;;  %1590 = vmatpush.bf16.msra.mxu1 %v2713_v10  ;;  %v3014_v42 = vld [vmem:[#allocation9 + $0x290] sm:$0xf0]  ;;  %v3327_v10 = vld [vmem:[#allocation9 + $0x16c] sm:$0xf0] }
 0x11d   : > { %v3017_v48 = vor.u32 %v3357_v41, %v3014_v42  ;;  %v3304_v41 = vld [vmem:[#allocation9 + $0xb4] sm:$0xf0]  ;;  %v3298_v42 = vld [vmem:[#allocation9 + $0x8c] sm:$0xf] }
 0x11e   : > { %v2785_v49 = vor.u32 %v3298_v42, %v2782_v43 }
 0x11f   : > { %1604 = vmatpush.bf16.msra.mxu2 %v2717_v11  ;;  %v2925_v11 = vor.u32 %v3340_v4, %v2924_v3 }
 0x120   : > { %1616 = vmatpush.bf16.msra.mxu3 %v2817_v54  ;;  %v2966_v54 = vld [vmem:[#allocation9 + $0x230] sm:$0xf0] }
 0x121   : > { %v2969_v60 = vor.u32 %v3345_v53, %v2966_v54  ;;  %v3292_v53 = vld [vmem:[#allocation9 + $0x54] sm:$0xf0]  ;;  %v3286_v54 = vld [vmem:[#allocation9 + $0x2c] sm:$0xf] }
 0x124   : > { %1617 = vmatpush.bf16.msra.mxu3 %v2769_v2  ;;  %v2918_v2 = vld [vmem:[#allocation9 + $0x1d0] sm:$0xf0] }
 0x125   : > { %v2921_v8 = vor.u32 %v3333_v1, %v2918_v2  ;;  %v1011_v1 = vperm.slane %v1005_v62, 2  ;;  %v1012_v2 = vperm.slane %v1005_v62, 3 }
 0x128   : > { %1618 = vmatpush.bf16.msra.mxu3 %v2721_v14  ;;  %v2870_v14 = vld [vmem:[#allocation9 + $0x170] sm:$0xf0] }
 0x17d   : > { %v811_v15 = vpop.f32.mrf.mxu2 }
 0x185   : > { %v813_v19 = vpop.f32.mrf.mxu2 }
 0x18e   : > { %v895_v16 = vpop.f32.mrf.mxu3 }
 0x18f   : > { %v896_v17 = vadd.f32 %v895_v16, %v811_v15  ;;  %v2876_v15 = vld [vmem:[#allocation9 + $0x148] sm:$0xf]  ;;  %v3328_v16 = vld [vmem:[#allocation9 + $0x174] sm:$0xf0] }
 0x191   : > { %v904_v21 = vadd.f32 %v3564_v18, %v896_v17  ;;  %v3322_v17 = vld [vmem:[#allocation9 + $0x14c] sm:$0xf] }
 0x193   : > { %v906_v30 = vmax.f32 %v904_v21, 0.0  ;;  %v2820_v21 = vld [vmem:[#allocation9 + $0xe0] sm:$0xf] }
 0x196   : > { %v897_v20 = vpop.f32.mrf.mxu3 }
 0x197   : > { %v898_v22 = vadd.f32 %v897_v20, %v813_v19  ;;  %v2869_v19 = vor.u32 %v3327_v10, %v2868_v9  ;;  %v2873_v20 = vor.u32 %v3321_v13, %v2870_v14  ;;  %v1014_v14 = vperm.slane %v1005_v62, 5 }
 0x199   : > { %v905_v23 = vadd.f32 %v3564_v18, %v898_v22  ;;  %v2878_v18 = vld [vmem:[#allocation9 + $0x178] sm:$0xf0]  ;;  %v3315_v22 = vld [vmem:[#allocation9 + $0x10c] sm:$0xf0] }
 0x19a   : > { %v2881_v24 = vor.u32 %v3322_v17, %v2878_v18 }
 0x19b   : > { %v907_v31 = vmax.f32 %v905_v23, 0.0  ;;  %v2877_v23 = vor.u32 %v3328_v16, %v2876_v15 }
 0x19d   : > { %v4138_v34 = vpack.c.bf16 %v907_v31, %v906_v30  ;;  %v2830_v30 = vld [vmem:[#allocation9 + $0x118] sm:$0xf0]  ;;  %v2821_v31 = vor.u32 %v3315_v22, %v2820_v21  ;;  %v1010_v21 = vperm.slane %v1005_v62, 1 }
 0x19e   : > { %v2833_v37 = vor.u32 %v3310_v29, %v2830_v30 }
 0x19f   : > { %1521 = vmatmul.bf16.vlgmr.msrb.gmra.mxu0 %v4138_v34  ;;  %1535 = vmatmul.bf16.vlgmr.msrb.gmra.mxu1 %v4138_v34 }
 0x1a0   : > { %1549 = vmatmul.bf16.vlgmr.msrb.gmra.mxu2 %v4138_v34  ;;  %1563 = vmatmul.bf16.vlgmr.msrb.gmra.mxu3 %v4138_v34 }
 0x1a1   : > { %1625 = vmatpush.bf16.msrb.mxu0 %v3061_v35  ;;  %1639 = vmatpush.bf16.msrb.mxu1 %v3065_v36  ;;  %v3303_v35 = vld [vmem:[#allocation9 + $0xac] sm:$0xf0]  ;;  %v2829_v36 = vor.u32 %v3316_v28, %v2828_v27  ;;  %v1015_v27 = vperm.slane %v1005_v62, 6  ;;  %v1016_v28 = vperm.slane %v1005_v62, 7 }
 0x1a2   : > { %1653 = vmatpush.bf16.msrb.mxu2 %v3069_v39  ;;  %1667 = vmatpush.bf16.msrb.mxu3 %v3073_v40  ;;  %v2774_v39 = vld [vmem:[#allocation9 + $0xb0] sm:$0xf0]  ;;  %v2780_v40 = vld [vmem:[#allocation9 + $0x88] sm:$0xf]  ;;  %v2773_v44 = vor.u32 %v3303_v35, %v2772_v33 }
 0x1a3   : > { %v2777_v45 = vor.u32 %v3297_v38, %v2774_v39 }
 0x1a5   : > { %1626 = vmatpush.bf16.msrb.mxu0 %v3013_v47  ;;  %1640 = vmatpush.bf16.msrb.mxu1 %v3017_v48  ;;  %v3291_v47 = vld [vmem:[#allocation9 + $0x4c] sm:$0xf0]  ;;  %v2781_v48 = vor.u32 %v3304_v41, %v2780_v40 }
 0x1a6   : > { %1654 = vmatpush.bf16.msrb.mxu2 %v3021_v51  ;;  %1668 = vmatpush.bf16.msrb.mxu3 %v3025_v52  ;;  %v2726_v51 = vld [vmem:[#allocation9 + $0x50] sm:$0xf0]  ;;  %v2732_v52 = vld [vmem:[#allocation9 + $0x28] sm:$0xf]  ;;  %v2725_v56 = vor.u32 %v3291_v47, %v2724_v46 }
 0x1a7   : > { %v2729_v57 = vor.u32 %v3285_v50, %v2726_v51  ;;  %v2733_v58 = vor.u32 %v3292_v53, %v2732_v52  ;;  %v1006_v51 = vld [vmem:[#allocation11 + $0x8] sm:$0xf] }
 0x1a9   : > { %1627 = vmatpush.bf16.msrb.mxu0 %v2965_v59  ;;  %1641 = vmatpush.bf16.msrb.mxu1 %v2969_v60  ;;  %v2737_v59 = vor.u32 %v3286_v54, %v2734_v55 }
 0x1aa   : > { %1655 = vmatpush.bf16.msrb.mxu2 %v2973_v63  ;;  %1669 = vmatpush.bf16.msrb.mxu3 %v2977_v0 }
 0x1ad   : > { %1628 = vmatpush.bf16.msrb.mxu0 %v2917_v7  ;;  %1642 = vmatpush.bf16.msrb.mxu1 %v2921_v8 }
 0x1ae   : > { %1656 = vmatpush.bf16.msrb.mxu2 %v2925_v11  ;;  %1670 = vmatpush.bf16.msrb.mxu3 %v2929_v12 }
 0x1af   : > { %1577 = vmatmul.bf16.vlgmr.msra.gmra.mxu0 %v4138_v34  ;;  %1591 = vmatmul.bf16.vlgmr.msra.gmra.mxu1 %v4138_v34 }
 0x1b0   : > { %1605 = vmatmul.bf16.vlgmr.msra.gmra.mxu2 %v4138_v34  ;;  %1619 = vmatmul.bf16.vlgmr.msra.gmra.mxu3 %v4138_v34 }
 0x1b1   : > { %1629 = vmatpush.bf16.msrb.mxu0 %v2869_v19  ;;  %1643 = vmatpush.bf16.msrb.mxu1 %v2873_v20  ;;  %v1009_v20 = vperm.slane %v1005_v62, 0 }
 0x1b2   : > { %1657 = vmatpush.bf16.msrb.mxu2 %v2877_v23  ;;  %1671 = vmatpush.bf16.msrb.mxu3 %v2881_v24 }
 0x1b5   : > { %1630 = vmatpush.bf16.msrb.mxu0 %v2821_v31  ;;  %1644 = vmatpush.bf16.msrb.mxu1 %v2825_v32 }
 0x1b6   : > { %1658 = vmatpush.bf16.msrb.mxu2 %v2829_v36  ;;  %1672 = vmatpush.bf16.msrb.mxu3 %v2833_v37 }
 0x1b9   : > { %1631 = vmatpush.bf16.msrb.mxu0 %v2773_v44  ;;  %1645 = vmatpush.bf16.msrb.mxu1 %v2777_v45  ;;  %v3392_v45 = vld [vmem:[#allocation12 + $0x78] sm:$0xff] }
 0x1ba   : > { %1659 = vmatpush.bf16.msrb.mxu2 %v2781_v48  ;;  %1673 = vmatpush.bf16.msrb.mxu3 %v2785_v49 }
 0x1bd   : > { %1632 = vmatpush.bf16.msrb.mxu0 %v2725_v56  ;;  %1646 = vmatpush.bf16.msrb.mxu1 %v2729_v57 }
 0x1be   : > { %1660 = vmatpush.bf16.msrb.mxu2 %v2733_v58  ;;  %1674 = vmatpush.bf16.msrb.mxu3 %v2737_v59  ;;  %v1017_v59 = vperm.slane %v1006_v51, 0 }
 0x1c0   : > { %1633 = vmatmul.bf16.vlgmr.msrb.gmra.mxu0 %v4138_v34  ;;  %1647 = vmatmul.bf16.vlgmr.msrb.gmra.mxu1 %v4138_v34 }
 0x1c1   : > { %1661 = vmatmul.bf16.vlgmr.msrb.gmra.mxu2 %v4138_v34  ;;  %1675 = vmatmul.bf16.vlgmr.msrb.gmra.mxu3 %v4138_v34  ;;  %v1013_v34 = vperm.slane %v1005_v62, 4 }
 0x21c   : > { %v1522_v60 = vpop.f32.mrf.mxu0  ;;  %v1536_v61 = vpop.f32.mrf.mxu1 }
 0x21d   : > { %v1523_v35 = vadd.f32 %v1522_v60, %v1009_v20  ;;  %v1537_v36 = vadd.f32 %v1536_v61, %v1010_v21  ;;  %v1018_v60 = vperm.slane %v1006_v51, 1  ;;  %v3391_v61 = vld [vmem:[#allocation12 + $0x70] sm:$0xff] }
 0x21f   : > { %v1681_v46 = vpack.c.bf16 %v1537_v36, %v1523_v35 }
 0x221   : > { %v1695_v62 = vunpack.c.l.b16 %v1681_v46 }
 0x223   : > { %v1550_v63 = vpop.f32.mrf.mxu2  ;;  %v1564_v0 = vpop.f32.mrf.mxu3 }
 0x224   : > { %v1524_v3 = vpop.f32.mrf.mxu0  ;;  %v1538_v4 = vpop.f32.mrf.mxu1  ;;  %v1551_v5 = vadd.f32 %v1550_v63, %v1011_v1  ;;  %v1565_v6 = vadd.f32 %v1564_v0, %v1012_v2 }
 0x225   : > { %v1525_v25 = vadd.f32 %v1524_v3, %v1009_v20  ;;  %v1539_v26 = vadd.f32 %v1538_v4, %v1010_v21  ;;  %v1783_v4 = vunpack.c.h.b16 %v1681_v46 }
 0x226   : > { %v4152_v9 = vpack.c.bf16 %v1565_v6, %v1551_v5 }
 0x227   : > { %v1687_v38 = vpack.c.bf16 %v1539_v26, %v1525_v25 }
 0x228   : > { %v2145_v16 = vunpack.c.h.b16 %v4152_v9 }
 0x229   : > { %v1696_v55 = vunpack.c.l.b16 %v1687_v38  ;;  %v1784_v63 = vunpack.c.h.b16 %v1687_v38 }
 0x22b   : > { %v1552_v7 = vpop.f32.mrf.mxu2  ;;  %v1566_v8 = vpop.f32.mrf.mxu3  ;;  %v1697_v5 = vpack.c.b16 %v1696_v55, %v1695_v62 }
 0x22c   : > { %v1553_v10 = vadd.f32 %v1552_v7, %v1011_v1  ;;  %v1567_v11 = vadd.f32 %v1566_v8, %v1012_v2  ;;  %v1578_v12 = vpop.f32.mrf.mxu0  ;;  %v1592_v13 = vpop.f32.mrf.mxu1 }
 0x22d   : > { %v1579_v18 = vadd.f32 %v1578_v12, %v1013_v34  ;;  %v1593_v19 = vadd.f32 %v1592_v13, %v1014_v14  ;;  %v1785_v12 = vpack.c.b16 %v1784_v63, %v1783_v4 }
 0x22e   : > { %v4154_v15 = vpack.c.bf16 %v1567_v11, %v1553_v10  ;;  %v3390_v11 = vld [vmem:[#allocation12 + $0x68] sm:$0xff] }
 0x22f   : > { %v1683_v31 = vpack.c.bf16 %v1593_v19, %v1579_v18 }
 0x230   : > { %v2146_v17 = vunpack.c.h.b16 %v4154_v15 }
 0x231   : > { %v1701_v41 = vunpack.c.l.b16 %v1683_v31  ;;  %v1787_v42 = vunpack.c.h.b16 %v1683_v31  ;;  %v3388_v31 = vld [vmem:[#allocation12 + $0x58] sm:$0xff] }
 0x232   : > { %v4158_v22 = vpack.c.b16 %v2146_v17, %v2145_v16  ;;  %v1020_v16 = vperm.slane %v1006_v51, 3 }
 0x233   : > { %v1606_v23 = vpop.f32.mrf.mxu2  ;;  %v1620_v24 = vpop.f32.mrf.mxu3 }
 0x234   : > { %v1580_v29 = vpop.f32.mrf.mxu0  ;;  %v1594_v30 = vpop.f32.mrf.mxu1  ;;  %v1607_v39 = vadd.f32 %v1606_v23, %v1015_v27  ;;  %v1621_v40 = vadd.f32 %v1620_v24, %v1016_v28  ;;  %v3389_v23 = vld [vmem:[#allocation12 + $0x60] sm:$0xff] }
 0x235   : > { %v1581_v32 = vadd.f32 %v1580_v29, %v1013_v34  ;;  %v1595_v33 = vadd.f32 %v1594_v30, %v1014_v14  ;;  %v1019_v14 = vperm.slane %v1006_v51, 2 }
 0x236   : > { %v1684_v52 = vpack.c.bf16 %v1621_v40, %v1607_v39  ;;  %v1994_v40 = vunpack.c.l.b16 %v4154_v15 }
 0x237   : > { %v1689_v37 = vpack.c.bf16 %v1595_v33, %v1581_v32 }
 0x238   : > { %v1999_v0 = vunpack.c.l.b16 %v1684_v52  ;;  %v2149_v1 = vunpack.c.h.b16 %v1684_v52 }
 0x239   : > { %v1702_v43 = vunpack.c.l.b16 %v1689_v37  ;;  %v1788_v44 = vunpack.c.h.b16 %v1689_v37 }
 0x23b   : > { %v1703_v47 = vpack.c.b16 %v1702_v43, %v1701_v41  ;;  %v1789_v48 = vpack.c.b16 %v1788_v44, %v1787_v42  ;;  %v1608_v49 = vpop.f32.mrf.mxu2  ;;  %v1622_v50 = vpop.f32.mrf.mxu3  ;;  %v3387_v42 = vld [vmem:[#allocation12 + $0x50] sm:$0xff]  ;;  %v1993_v43 = vunpack.c.l.b16 %v4152_v9 }
 0x23c   : > { %v1609_v53 = vadd.f32 %v1608_v49, %v1015_v27  ;;  %v1623_v54 = vadd.f32 %v1622_v50, %v1016_v28  ;;  %v3385_v50 = vld [vmem:[#allocation12 + $0x40] sm:$0xff] }
 0x23d   : > { %v1634_v56 = vpop.f32.mrf.mxu0  ;;  %v1648_v57 = vpop.f32.mrf.mxu1  ;;  %1712 = vmatpush.bf16.xpose.msra.mxu0 %v1703_v47  ;;  %1798 = vmatpush.bf16.xpose.msra.mxu2 %v1789_v48  ;;  %v1995_v46 = vpack.c.b16 %v1994_v40, %v1993_v43  ;;  %v3386_v48 = vld [vmem:[#allocation12 + $0x48] sm:$0xff] }
 0x23e   : > { %v1690_v58 = vpack.c.bf16 %v1623_v54, %v1609_v53  ;;  %v1635_v8 = vadd.f32 %v1634_v56, %v1017_v59  ;;  %v1649_v10 = vadd.f32 %v1648_v57, %v1018_v60  ;;  %v3398_v43 = vld [vmem:[#allocation12 + $0xa8] sm:$0xff] }
 0x240   : > { %v2000_v2 = vunpack.c.l.b16 %v1690_v58  ;;  %v2150_v3 = vunpack.c.h.b16 %v1690_v58  ;;  %v1685_v19 = vpack.c.bf16 %v1649_v10, %v1635_v8 }
 0x242   : > { %v2001_v6 = vpack.c.b16 %v2000_v2, %v1999_v0  ;;  %v4160_v7 = vpack.c.b16 %v2150_v3, %v2149_v1  ;;  %v1745_v27 = vunpack.c.l.b16 %v1685_v19  ;;  %v1828_v28 = vunpack.c.h.b16 %v1685_v19 }
 0x244   : > { %v1662_v13 = vpop.f32.mrf.mxu2  ;;  %v1676_v34 = vpop.f32.mrf.mxu3  ;;  %1713 = vmatmul.bf16.vlgmr.msra.gmra.mxu0 %v1697_v5  ;;  %1799 = vmatmul.bf16.vlgmr.msra.gmra.mxu2 %v1785_v12 }
 0x245   : > { %1915 = vmatpush.bf16.msrb.mxu0 %v3392_v45  ;;  %2010 = vmatpush.bf16.xpose.msrb.mxu2 %v2001_v6  ;;  %v1636_v17 = vpop.f32.mrf.mxu0  ;;  %v1650_v18 = vpop.f32.mrf.mxu1  ;;  %v1663_v25 = vadd.f32 %v1662_v13, %v1019_v14  ;;  %v1677_v26 = vadd.f32 %v1676_v34, %v1020_v16 }
 0x246   : > { %v1637_v20 = vadd.f32 %v1636_v17, %v1017_v59  ;;  %v1651_v21 = vadd.f32 %v1650_v18, %v1018_v60 }
 0x247   : > { %v1686_v37 = vpack.c.bf16 %v1677_v26, %v1663_v25 }
 0x248   : > { %v1691_v24 = vpack.c.bf16 %v1651_v21, %v1637_v20 }
 0x249   : > { %1916 = vmatpush.bf16.msrb.mxu0 %v3391_v61  ;;  %v2042_v44 = vunpack.c.l.b16 %v1686_v37  ;;  %v2190_v51 = vunpack.c.h.b16 %v1686_v37 }
 0x24a   : > { %v1746_v29 = vunpack.c.l.b16 %v1691_v24  ;;  %v1829_v30 = vunpack.c.h.b16 %v1691_v24 }
 0x24c   : > { %v1747_v32 = vpack.c.b16 %v1746_v29, %v1745_v27  ;;  %v1830_v33 = vpack.c.b16 %v1829_v30, %v1828_v28  ;;  %v1664_v35 = vpop.f32.mrf.mxu2  ;;  %v1678_v36 = vpop.f32.mrf.mxu3 }
 0x24d   : > { %1917 = vmatpush.bf16.msrb.mxu0 %v3390_v11  ;;  %v1665_v38 = vadd.f32 %v1664_v35, %v1019_v14  ;;  %v1679_v39 = vadd.f32 %v1678_v36, %v1020_v16 }
 0x24e   : > { %1759 = vmatpush.bf16.msra.mxu1 %v1747_v32  ;;  %1842 = vmatpush.bf16.msra.mxu3 %v1830_v33 }
 0x24f   : > { %v1692_v41 = vpack.c.bf16 %v1679_v39, %v1665_v38 }
 0x251   : > { %1918 = vmatpush.bf16.msrb.mxu0 %v3389_v23  ;;  %v2043_v45 = vunpack.c.l.b16 %v1692_v41  ;;  %v2191_v49 = vunpack.c.h.b16 %v1692_v41 }
 0x253   : > { %v2044_v47 = vpack.c.b16 %v2043_v45, %v2042_v44  ;;  %v2192_v52 = vpack.c.b16 %v2191_v49, %v2190_v51  ;;  %v3397_v44 = vld [vmem:[#allocation12 + $0xa0] sm:$0xff]  ;;  %v3396_v45 = vld [vmem:[#allocation12 + $0x98] sm:$0xff] }
 0x254   : > { %2011 = vmatmul.bf16.vlgmr.msrb.gmra.mxu2 %v1995_v46  ;;  %v3395_v46 = vld [vmem:[#allocation12 + $0x90] sm:$0xff] }
 0x255   : > { %1919 = vmatpush.bf16.msrb.mxu0 %v3388_v31  ;;  %2056 = vmatpush.bf16.msrb.mxu3 %v2044_v47  ;;  %v3394_v47 = vld [vmem:[#allocation12 + $0x88] sm:$0xff] }
 0x259   : > { %1920 = vmatpush.bf16.msrb.mxu0 %v3387_v42  ;;  %v3400_v42 = vld [vmem:[#allocation12 + $0xb8] sm:$0xff] }
 0x25a   : > { %2129 = vmatpush.bf16.msra.mxu2 %v3400_v42 }
 0x25d   : > { %1921 = vmatpush.bf16.msrb.mxu0 %v3386_v48  ;;  %v3393_v48 = vld [vmem:[#allocation12 + $0x80] sm:$0xff] }
 0x261   : > { %1922 = vmatpush.bf16.msrb.mxu0 %v3385_v50 }
 0x265   : > { %2204 = vmatpush.bf16.msra.mxu0 %v2192_v52 }
 0x2c1   : > { %v1714_v10 = vpop.f32.mrf.mxu0 }
 0x2c2   : > { %v1720_v16 = vsel %vm1719_vm1, %v1714_v10, -inf }
 0x2c7   : > { %v1800_v15 = vpop.f32.mrf.mxu2 }
 0x2c8   : > { %v1805_v53 = vsel %vm1719_vm1, %v1800_v15, -inf }
 0x2c9   : > { %1806 = vmax.xlane.f32.xlu0 %v1805_v53  ;;  %v1716_v17 = vpop.f32.mrf.mxu0 }
 0x2ca   : > { %v1723_v20 = vsel %vm1719_vm1, %v1716_v17, -inf }
 0x2cf   : > { %v1802_v9 = vpop.f32.mrf.mxu2 }
 0x2d0   : > { %v1808_v54 = vsel %vm1719_vm1, %v1802_v9, -inf }
 0x2d1   : > { %1809 = vmax.xlane.f32.xlu0 %v1808_v54 }
 0x2d7   : > { %v2012_v55 = vpop.f32.mrf.mxu2 }
 0x2d8   : > { %v2017_v56 = vsel %vm1719_vm1, %v2012_v55, -inf }
 0x2d9   : > { %2018 = vmax.xlane.f32.xlu1 %v2017_v56 }
 0x2df   : > { %v2014_v57 = vpop.f32.mrf.mxu2 }
 0x2e0   : > { %v2020_v58 = vsel %vm1719_vm1, %v2014_v57, -inf }
 0x2e1   : > { %2021 = vmax.xlane.f32.xlu1 %v2020_v58 }
 0x33c   : > { %v1807_v59 = vpop.xlane.xlu0 %1806 }
 0x33d   : > { %v1811_v60 = vsub.f32 %v1800_v15, %v1807_v59 }
 0x33f   : > { %v1813_v61 = vmul.f32 1.442695, %v1811_v60 }
 0x341   : > { %3567 = vpow2.f32 %v1813_v61  ;;  %v3384_v61 = vld [vmem:[#allocation12 + $0x38] sm:$0xff] }
 0x342   : > { %1977 = vmatpush.bf16.msrb.mxu1 %v3384_v61 }
 0x344   : > { %v1810_v62 = vpop.xlane.xlu0 %1809 }
 0x345   : > { %v1812_v63 = vsub.f32 %v1802_v9, %v1810_v62 }
 0x347   : > { %v3568_v0 = vpop.eup %3567  ;;  %v1815_v1 = vmul.f32 1.442695, %v1812_v63 }
 0x348   : > { %v1817_v2 = vsel %vm1719_vm1, %v3568_v0, 0.0 }
 0x349   : > { %3569 = vpow2.f32 %v1815_v1  ;;  %1818 = vadd.xlane.f32.xlu2 %v1817_v2 }
 0x34c   : > { %v2019_v3 = vpop.xlane.xlu1 %2018 }
 0x34d   : > { %v2023_v4 = vsub.f32 %v2012_v55, %v2019_v3 }
 0x34f   : > { %v3570_v5 = vpop.eup %3569  ;;  %v2025_v6 = vmul.f32 1.442695, %v2023_v4 }
 0x350   : > { %v1820_v8 = vsel %vm1719_vm1, %v3570_v5, 0.0 }
 0x351   : > { %3571 = vpow2.f32 %v2025_v6  ;;  %1821 = vadd.xlane.f32.xlu2 %v1820_v8 }
 0x354   : > { %v2022_v11 = vpop.xlane.xlu1 %2021 }
 0x355   : > { %v2024_v12 = vsub.f32 %v2014_v57, %v2022_v11 }
 0x357   : > { %v3572_v13 = vpop.eup %3571  ;;  %v2027_v34 = vmul.f32 1.442695, %v2024_v12 }
 0x358   : > { %v2029_v14 = vsel %vm1719_vm1, %v3572_v13, 0.0 }
 0x359   : > { %3573 = vpow2.f32 %v2027_v34  ;;  %2030 = vadd.xlane.f32.xlu0 %v2029_v14  ;;  %1721 = vmax.xlane.f32.xlu2 %v1720_v16 }
 0x35f   : > { %v3574_v18 = vpop.eup %3573 }
 0x360   : > { %v2032_v19 = vsel %vm1719_vm1, %v3574_v18, 0.0 }
 0x361   : > { %2033 = vadd.xlane.f32.xlu1 %v2032_v19  ;;  %1724 = vmax.xlane.f32.xlu0 %v1723_v20  ;;  %v3381_v19 = vld [vmem:[#allocation12 + $0x20] sm:$0xff]  ;;  %v3380_v20 = vld [vmem:[#allocation12 + $0x18] sm:$0xff] }
 0x3bc   : > { %v1819_v21 = vpop.xlane.xlu2 %1818 }
 0x3bd   : > { %3575 = vrcp.f32 %v1819_v21  ;;  %v3379_v21 = vld [vmem:[#allocation12 + $0x10] sm:$0xff] }
 0x3c3   : > { %v3576_v24 = vpop.eup %3575 }
 0x3c4   : > { %v1822_v23 = vpop.xlane.xlu2 %1821  ;;  %v1825_v26 = vmul.f32 %v3576_v24, %v3568_v0  ;;  %v3377_v24 = vld [vmem:[#allocation12] sm:$0xff] }
 0x3c5   : > { %3577 = vrcp.f32 %v1822_v23  ;;  %v3378_v23 = vld [vmem:[#allocation12 + $0x8] sm:$0xff] }
 0x3cb   : > { %v3578_v25 = vpop.eup %3577 }
 0x3cc   : > { %v1826_v27 = vmul.f32 %v3578_v25, %v3570_v5  ;;  %v1722_v28 = vpop.xlane.xlu2 %1721  ;;  %v2031_v32 = vpop.xlane.xlu0 %2030  ;;  %v3416_v25 = vld [vmem:[#allocation14 + $0x38] sm:$0xff] }
 0x3cd   : > { %v1726_v29 = vsub.f32 %v1714_v10, %v1722_v28  ;;  %v3407_v28 = vld [vmem:[#allocation12 + $0xf0] sm:$0xff] }
 0x3ce   : > { %v1827_v30 = vpack.c.bf16 %v1826_v27, %v1825_v26  ;;  %v3408_v26 = vld [vmem:[#allocation12 + $0xf8] sm:$0xff]  ;;  %v3415_v27 = vld [vmem:[#allocation14 + $0x30] sm:$0xff] }
 0x3cf   : > { %v1728_v31 = vmul.f32 1.442695, %v1726_v29  ;;  %v3414_v29 = vld [vmem:[#allocation14 + $0x28] sm:$0xff] }
 0x3d0   : > { %3075 = vmatmul.msk.bf16.vlgmr.msra.gmra.mxu3 %vm1719_vm1, %v1827_v30  ;;  %v3406_v30 = vld [vmem:[#allocation12 + $0xe8] sm:$0xff] }
 0x3d1   : > { %3579 = vpow2.f32 %v1728_v31  ;;  %2160 = vmatpush.bf16.xpose.msra.mxu3 %v4160_v7  ;;  %v3399_v7 = vld [vmem:[#allocation12 + $0xb0] sm:$0xff] }
 0x3d2   : > { %3581 = vrcp.f32 %v2031_v32  ;;  %2130 = vmatpush.bf16.msra.mxu2 %v3399_v7  ;;  %v3413_v32 = vld [vmem:[#allocation14 + $0x20] sm:$0xff] }
 0x3d4   : > { %v2034_v33 = vpop.xlane.xlu1 %2033  ;;  %v1725_v52 = vpop.xlane.xlu0 %1724 }
 0x3d5   : > { %3583 = vrcp.f32 %v2034_v33  ;;  %v1727_v15 = vsub.f32 %v1716_v17, %v1725_v52  ;;  %v3383_v17 = vld [vmem:[#allocation12 + $0x30] sm:$0xff]  ;;  %v3405_v33 = vld [vmem:[#allocation12 + $0xe0] sm:$0xff] }
 0x3d6   : > { %2131 = vmatpush.bf16.msra.mxu2 %v3398_v43  ;;  %1978 = vmatpush.bf16.msrb.mxu1 %v3383_v17 }
 0x3d7   : > { %v4176_v35 = vpop.eup %3579  ;;  %v1730_v54 = vmul.f32 1.442695, %v1727_v15 }
 0x3d8   : > { %v1732_v36 = vsel %vm1719_vm1, %v4176_v35, 0.0  ;;  %v3582_v37 = vpop.eup %3581 }
 0x3d9   : > { %1733 = vadd.xlane.f32.xlu0 %v1732_v36  ;;  %v2037_v39 = vmul.f32 %v3582_v37, %v3572_v13  ;;  %3585 = vpow2.f32 %v1730_v54  ;;  %v3412_v36 = vld [vmem:[#allocation14 + $0x18] sm:$0xff] }
 0x3da   : > { %2132 = vmatpush.bf16.msra.mxu2 %v3397_v44  ;;  %v3404_v37 = vld [vmem:[#allocation12 + $0xd8] sm:$0xff] }
 0x3db   : > { %v3584_v38 = vpop.eup %3583 }
 0x3dc   : > { %v2038_v40 = vmul.f32 %v3584_v38, %v3574_v18  ;;  %v3382_v18 = vld [vmem:[#allocation12 + $0x28] sm:$0xff] }
 0x3dd   : > { %1979 = vmatpush.bf16.msrb.mxu1 %v3382_v18 }
 0x3de   : > { %v2039_v41 = vpack.c.bf16 %v2038_v40, %v2037_v39  ;;  %2133 = vmatpush.bf16.msra.mxu2 %v3396_v45  ;;  %v3411_v39 = vld [vmem:[#allocation14 + $0x10] sm:$0xff] }
 0x3df   : > { %v3586_v57 = vpop.eup %3585 }
 0x3e0   : > { %3140 = vmatmul.msk.bf16.vlgmr.msrb.gmra.mxu3 %vm1719_vm1, %v2039_v41  ;;  %v1735_v60 = vsel %vm1719_vm1, %v3586_v57, 0.0 }
 0x3e1   : > { %1980 = vmatpush.bf16.msrb.mxu1 %v3381_v19  ;;  %2373 = vmatpush.bf16.msrb.mxu3 %v3416_v25 }
 0x3e2   : > { %2134 = vmatpush.bf16.msra.mxu2 %v3395_v46  ;;  %v3410_v46 = vld [vmem:[#allocation14 + $0x8] sm:$0xff] }
 0x3e5   : > { %1981 = vmatpush.bf16.msrb.mxu1 %v3380_v20  ;;  %2374 = vmatpush.bf16.msrb.mxu3 %v3415_v27 }
 0x3e6   : > { %2135 = vmatpush.bf16.msra.mxu2 %v3394_v47  ;;  %v3409_v47 = vld [vmem:[#allocation14] sm:$0xff] }
 0x3e9   : > { %1982 = vmatpush.bf16.msrb.mxu1 %v3379_v21  ;;  %2375 = vmatpush.bf16.msrb.mxu3 %v3414_v29 }
 0x3ea   : > { %2136 = vmatpush.bf16.msra.mxu2 %v3393_v48  ;;  %v3248_v48 = vld [vmem:[%s4111_s21] sm:$0xff]  ;;  %s2407_s21 = scalar_lea.hbm %s4267_s6, %s3417_s12 }
 0x3eb   : > { %s2410_s16 = sshll.u32 %s2407_s21, 4  ;;  %s2411_s16 = int_to_ptr.hbm [resolvable:$true] %s2410_s16 }
 0x3ec   : > { %s3823_s14 = sshra.s32 %s2411_s16, 4  ;;  %s3824_s14 = int_to_ptr.hbm [resolvable:$true] %s3823_s14 }
 0x3ed   : > { %1983 = vmatpush.bf16.msrb.mxu1 %v3378_v23  ;;  %2376 = vmatpush.bf16.msrb.mxu3 %v3413_v32  ;;  %s3825_s27 = scalar_lea.hbm %s3824_s14, 8  ;;  %p3830_p12 = scmp.lt.s32.totalorder %s3824_s14, %s4267_s6 }
 0x3ee   : > { %p3826_p1 = scmp.ne.s32.totalorder %s3824_s14, %s3825_s27  ;;  %p3831_p7 = scmp.lt.s32.totalorder %s3829_s3, %s3825_s27 }
 0x3f0   : > { %2161 = vmatmul.bf16.vlgmr.msra.gmra.mxu3 %v4158_v22  ;;  %p3827_p3 = pnand %p3826_p1, %p4071_p4  ;;  %p3832_p8 = por %p3831_p7, %p3830_p12 }
 0x3f1   : > { %1984 = vmatpush.bf16.msrb.mxu1 %v3377_v24  ;;  %2377 = vmatpush.bf16.msrb.mxu3 %v3412_v36 }
 0x3f2   : > { %p3828_p5 = pneg %p3827_p3 }
 0x3f4   : > { %p3833_p9 = pnand %p3832_p8, %p3828_p5 }
 0x3f5   : > { %2378 = vmatpush.bf16.msrb.mxu3 %v3411_v39 }
 0x3f9   : > { %2379 = vmatpush.bf16.msrb.mxu3 %v3410_v46 }
 0x3fd   : > { %2380 = vmatpush.bf16.msrb.mxu3 %v3409_v47 }
 0x400   : > { %2381 = vmatmul.bf16.vlgmr.msrb.gmra.mxu3 %v3248_v48 }
 0x44c   : > { %v1734_v1 = vpop.xlane.xlu0 %1733 }
 0x453   : > { %v1844_v49 = vpop.f32.mrf.mxu3 }
 0x45b   : > { %v1846_v50 = vpop.f32.mrf.mxu3 }
 0x45c   : > { %v1849_v51 = vpack.c.bf16 %v1846_v50, %v1844_v49  ;;  %v3403_v49 = vld [vmem:[#allocation12 + $0xd0] sm:$0xff]  ;;  %v3402_v50 = vld [vmem:[#allocation12 + $0xc8] sm:$0xff] }
 0x45e   : > { %1923 = vmatmul.bf16.vlgmr.msrb.gmra.mxu0 %v1849_v51  ;;  %v3401_v51 = vld [vmem:[#allocation12 + $0xc0] sm:$0xff] }
 0x463   : > { %v2058_v22 = vpop.f32.mrf.mxu3 }
 0x46b   : > { %v2060_v53 = vpop.f32.mrf.mxu3 }
 0x46c   : > { %v2063_v9 = vpack.c.bf16 %v2060_v53, %v2058_v22 }
 0x46e   : > { %2137 = vmatmul.bf16.vlgmr.msra.gmra.mxu2 %v2063_v9 }
 0x473   : > { %v2162_v55 = vpop.f32.mrf.mxu3 }
 0x474   : > { %v2167_v56 = vsel %vm1719_vm1, %v2162_v55, -inf }
 0x475   : > { %2168 = vmax.xlane.f32.xlu1 %v2167_v56 }
 0x47b   : > { %v2164_v58 = vpop.f32.mrf.mxu3 }
 0x47c   : > { %v2170_v59 = vsel %vm1719_vm1, %v2164_v58, -inf }
 0x47d   : > { %2171 = vmax.xlane.f32.xlu2 %v2170_v59  ;;  %1736 = vadd.xlane.f32.xlu1 %v1735_v60 }
 0x4db   : > { %v1924_v22 = vpop.f32.mrf.mxu0 }
 0x4e3   : > { %v1926_v52 = vpop.f32.mrf.mxu0 }
 0x4e8   : > { %v2169_v62 = vpop.xlane.xlu1 %2168 }
 0x4e9   : > { %v2173_v63 = vsub.f32 %v2162_v55, %v2169_v62 }
 0x4eb   : > { %v2175_v0 = vmul.f32 1.442695, %v2173_v63  ;;  %v3565_v63 = vld [vmem:[%s4240_s8] ss:$0 sm:$0xff] }
 0x4ed   : > { %3587 = vpow2.f32 %v2175_v0  ;;  %v3566_v0 = vld [vmem:[%s4266_s28] ss:$0 sm:$0xff] }
 0x4ee   : > { %3589 = vrcp.f32 %v1734_v1 }
 0x4f0   : > { %v2172_v2 = vpop.xlane.xlu2 %2171  ;;  %v1737_v3 = vpop.xlane.xlu1 %1736 }
 0x4f1   : > { %v2174_v4 = vsub.f32 %v2164_v58, %v2172_v2  ;;  %3591 = vrcp.f32 %v1737_v3  ;;  %v2138_v56 = vpop.f32.mrf.mxu2  ;;  %v2382_v58 = vpop.f32.mrf.mxu3 }
 0x4f2   : > { %v2383_v3 = vadd.f32 %v3566_v0, %v2382_v58 }
 0x4f3   : > { %v3588_v5 = vpop.eup %3587  ;;  %v2177_v6 = vmul.f32 1.442695, %v2174_v4 }
 0x4f4   : > { %v2179_v8 = vsel %vm1719_vm1, %v3588_v5, 0.0  ;;  %v3590_v10 = vpop.eup %3589 }
 0x4f5   : > { %3593 = vpow2.f32 %v2177_v6  ;;  %2180 = vadd.xlane.f32.xlu2 %v2179_v8  ;;  %v1740_v12 = vmul.f32 %v3590_v10, %v4176_v35 }
 0x4f7   : > { %v3592_v11 = vpop.eup %3591 }
 0x4f8   : > { %v1741_v13 = vmul.f32 %v3592_v11, %v3586_v57 }
 0x4f9   : > { %v2140_v1 = vpop.f32.mrf.mxu2  ;;  %v2384_v6 = vpop.f32.mrf.mxu3 }
 0x4fa   : > { %v1742_v34 = vpack.c.bf16 %v1741_v13, %v1740_v12  ;;  %v2385_v12 = vadd.f32 %v3566_v0, %v2384_v6 }
 0x4fb   : > { %v3594_v14 = vpop.eup %3593 }
 0x4fc   : > { %3074 = vmatmul.msk.bf16.vlgmr.msra.gmra.mxu1 %vm1719_vm1, %v1742_v34  ;;  %v2182_v16 = vsel %vm1719_vm1, %v3594_v14, 0.0 }
 0x4fd   : > { %2183 = vadd.xlane.f32.xlu0 %v2182_v16  ;;  %2277 = vmatpush.bf16.msra.mxu1 %v3408_v26 }
 0x501   : > { %2278 = vmatpush.bf16.msra.mxu1 %v3407_v28 }
 0x505   : > { %2279 = vmatpush.bf16.msra.mxu1 %v3406_v30 }
 0x509   : > { %2280 = vmatpush.bf16.msra.mxu1 %v3405_v33 }
 0x50d   : > { %2281 = vmatpush.bf16.msra.mxu1 %v3404_v37 }
 0x511   : > { %2282 = vmatpush.bf16.msra.mxu1 %v3403_v49 }
 0x515   : > { %2283 = vmatpush.bf16.msra.mxu1 %v3402_v50 }
 0x519   : > { %2284 = vmatpush.bf16.msra.mxu1 %v3401_v51 }
 0x568   : > { %v2181_v31 = vpop.xlane.xlu2 %2180 }
 0x569   : > { %3595 = vrcp.f32 %v2181_v31 }
 0x56f   : > { %v3596_v38 = vpop.eup %3595 }
 0x570   : > { %v2184_v35 = vpop.xlane.xlu0 %2183  ;;  %v2187_v41 = vmul.f32 %v3596_v38, %v3588_v5 }
 0x571   : > { %3597 = vrcp.f32 %v2184_v35 }
 0x577   : > { %v3598_v40 = vpop.eup %3597 }
 0x578   : > { %v2188_v42 = vmul.f32 %v3598_v40, %v3594_v14 }
 0x579   : > { %v1761_v7 = vpop.f32.mrf.mxu1 }
 0x57a   : > { %v2189_v43 = vpack.c.bf16 %v2188_v42, %v2187_v41 }
 0x57c   : > { %3173 = vmatmul.msk.bf16.vlgmr.msra.gmra.mxu0 %vm1719_vm1, %v2189_v43 }
 0x581   : > { %v1763_v44 = vpop.f32.mrf.mxu1 }
 0x582   : > { %v1766_v45 = vpack.c.bf16 %v1763_v44, %v1761_v7 }
 0x584   : > { %1985 = vmatmul.bf16.vlgmr.msrb.gmra.mxu1 %v1766_v45 }
 0x5f9   : > { %v2206_v15 = vpop.f32.mrf.mxu0 }
 0x601   : > { %v2208_v53 = vpop.f32.mrf.mxu0  ;;  %v1986_v54 = vpop.f32.mrf.mxu1 }
 0x602   : > { %v2211_v9 = vpack.c.bf16 %v2208_v53, %v2206_v15  ;;  %v1987_v57 = vadd.f32 %v1986_v54, %v1924_v22 }
 0x604   : > { %2285 = vmatmul.bf16.vlgmr.msra.gmra.mxu1 %v2211_v9  ;;  %v2143_v60 = vadd.f32 %v2138_v56, %v1987_v57 }
 0x609   : > { %v1988_v55 = vpop.f32.mrf.mxu1 }
 0x60a   : > { %v1989_v61 = vadd.f32 %v1988_v55, %v1926_v52 }
 0x60c   : > { %v2144_v4 = vadd.f32 %v2140_v1, %v1989_v61 }
 0x681   : > { %v2286_v59 = vpop.f32.mrf.mxu1 }
 0x682   : > { %v2291_v62 = vadd.f32 %v2286_v59, %v2143_v60 }
 0x684   : > { %v2297_v2 = vadd.f32 %v3565_v63, %v2291_v62 }
 0x686   : > { %v2387_v10 = vadd.f32 %v2383_v3, %v2297_v2 }
 0x688   : > { %v2389_v34 = vmax.f32 %v2387_v10, 0.0 }
 0x689   : > { %v2288_v5 = vpop.f32.mrf.mxu1 }
 0x68a   : > { %v2292_v8 = vadd.f32 %v2288_v5, %v2144_v4 }
 0x68c   : > { %v2298_v11 = vadd.f32 %v3565_v63, %v2292_v8 }
 0x68e   : > { %v2388_v13 = vadd.f32 %v2385_v12, %v2298_v11 }
 0x690   : > { %v2390_v14 = vmax.f32 %v2388_v13, 0.0 }
 0x692   : > { %v3434_v16 = vpack.c.bf16 %v2390_v14, %v2389_v34 }
 0x694   : > { %3435 = vst [vmem:[%s503_s25] sm:$0xff] %v3434_v16  }
 0x695   : > { %3836 = shalt.err (!%p3833_p9)
}
 0x696   : > { %s3900_s23 = smov 64   ;;  %s3901_s12 = smov 4  }
 0x697   : > { %3475 = dma.vmem_to_hbm [thread:$0]  (%p4071_p4), %s2409_s15, 128, %s2411_s16, %s2396_s24, %s3900_s23, %s3900_s23, %s3901_s12  }
 0x698 PF: > { %s2425_s1 = sand.u32 1, %s3875_s17   ;;  %p4268_p10 = scmp.ge.s32.totalorder %s3887_s20, 2 }
 0x699   : > { %s2426_s10 = scalar_lea.sflag [#allocation5], %s2425_s1 }
 0x69a   : > { %p3501_p13 = pnand %p4268_p10, %p4075_p6 }
 0x69c   : > { %p3502_p11 = pneg %p3501_p13 }
 0x69e   : > { %3870 = dma.done.wait (%p3502_p11), %s2426_s10, 128  }
 0x69f   : > { %3872 = vsyncadd (%p3502_p11), %s2426_s10, 4294967168  ;;  %p27_p0 = scmp.ge.s32.totalorder %s4045_s13, 4   ;;  %s4269_s17 = smov %s3879_s18 }
 0x6a0   : > { %s4270_s18 = smov %s3883_s19  ;;  %s4271_s19 = smov %s4056_s30 }
 0x6a1   : > { %s4272_s20 = smov %s4045_s13  ;;  %29 = sbr.rel (!%p27_p0) target bundleno = 15 (0xf), region = 138 }
 0x6a6   :  { %2432 = vsyncpa [#allocation4], 1 }
 0x6a7   :  { %2434 = vsyncpa [#allocation4 + $0x1], 1 }
 0x6a8   :  { %2435 = vsyncpa [#allocation7], 1 }
 0x6a9   :  { %2436 = vsyncpa [#allocation10], 1 }
 0x6aa   :  { %2437 = vsyncpa [#allocation13], 1 }
 0x6ab   :  { %2438 = vsyncpa [#allocation5], 1 }
 0x6ac   :  { %2440 = vsyncpa [#allocation5 + $0x1], 1 }

</bundles_post_ra>
